<compile_context>
chip_gen: v6e
topology: v6e:2x2x1
jax: 0.10.0
libtpu: 0.0.40
codegen_flags: <defaults>
</compile_context>

<pallas_src>
import jax
import jax.numpy as jnp
from jax.experimental import pallas as pl
from jax.experimental.pallas import tpu as pltpu

EPS = 1e-5


def layernorm_kernel(x_ref, gamma_ref, beta_ref, o_ref):
    # x_ref: (R, D) full block in VMEM; gamma/beta: (1, D).
    x = x_ref[...].astype(jnp.float32)

    mean = jnp.mean(x, axis=-1, keepdims=True)          # (R, 1)
    xc = x - mean                                        # centered (two-pass)
    var = jnp.mean(xc * xc, axis=-1, keepdims=True)      # (R, 1)
    inv = jax.lax.rsqrt(var + EPS)                       # EUP rsqrt

    gamma = gamma_ref[...].astype(jnp.float32)           # (1, D) broadcast
    beta = beta_ref[...].astype(jnp.float32)             # (1, D) broadcast

    # Direct broadcast chain: only xc is a full-size live temporary.
    o_ref[...] = (xc * inv * gamma + beta).astype(o_ref.dtype)


def layernorm(x, gamma, beta):
    """x: [..., D]; gamma, beta: [D]. LayerNorm over the last dim."""
    orig_shape = x.shape
    D = orig_shape[-1]
    R = 1
    for s in orig_shape[:-1]:
        R *= s
    x2 = x.reshape(R, D)
    g2 = gamma.reshape(1, D)
    b2 = beta.reshape(1, D)

    itemsize = jnp.dtype(x.dtype).itemsize
    cost = pl.CostEstimate(
        flops=8 * R * D,                    # sub, mul, sums, scale, affine
        transcendentals=R,                  # one rsqrt per row
        bytes_accessed=2 * R * D * itemsize + 2 * D * itemsize,
    )

    # Single full-array block (exempt from the (8,128) divisibility rule),
    # single grid step: the whole op is ~0.8 MB of HBM traffic, so any extra
    # grid steps or host-side pad/slice ops only add launch/DMA latency.
    out = pl.pallas_call(
        layernorm_kernel,
        out_shape=jax.ShapeDtypeStruct((R, D), x.dtype),
        grid=(1,),
        in_specs=[
            pl.BlockSpec((R, D), lambda i: (0, 0)),
            pl.BlockSpec((1, D), lambda i: (0, 0)),
            pl.BlockSpec((1, D), lambda i: (0, 0)),
        ],
        out_specs=pl.BlockSpec((R, D), lambda i: (0, 0)),
        cost_estimate=cost,
        compiler_params=pltpu.CompilerParams(
            dimension_semantics=("arbitrary",),
        ),
    )(x2, g2, b2)

    return out.reshape(orig_shape)


def layernorm_ref(x, gamma, beta):
    mean = jnp.mean(x, axis=-1, keepdims=True)
    var = jnp.mean((x - mean) ** 2, axis=-1, keepdims=True)
    return (x - mean) * jax.lax.rsqrt(var + EPS) * gamma + beta


if __name__ == "__main__":
    key = jax.random.PRNGKey(0)
    kx, kg, kb = jax.random.split(key, 3)

    # Input consistent with the module: [1, 14, 14, 512]
    x = jax.random.normal(kx, (1, 14, 14, 512), dtype=jnp.float32)

    # PyTorch default init is gamma=1, beta=0; perturb slightly so the affine
    # path is actually exercised.
    gamma = jnp.ones((512,), jnp.float32) + 0.01 * jax.random.normal(
        kg, (512,), jnp.float32
    )
    beta = 0.01 * jax.random.normal(kb, (512,), jnp.float32)

    out = layernorm(x, gamma, beta)
    out = jax.block_until_ready(out)

    ref = layernorm_ref(x, gamma, beta)
    assert out.shape == (1, 14, 14, 512)
    assert jnp.allclose(out, ref, atol=1e-5, rtol=1e-5), "mismatch vs reference"

    print("KERNEL_OK")
</pallas_src>

<mosaic_0001>
module attributes {stable_mosaic.version = 11 : i64} {
  func.func @layernorm_kernel(%arg0: i32, %arg1: memref<196x512xf32, #tpu.memory_space<vmem>>, %arg2: memref<1x512xf32, #tpu.memory_space<vmem>>, %arg3: memref<1x512xf32, #tpu.memory_space<vmem>>, %arg4: memref<196x512xf32, #tpu.memory_space<vmem>>) attributes {dimension_semantics = [#tpu.dimension_semantics<arbitrary>], iteration_bounds = array<i64: 1>, scalar_prefetch = 0 : i64, scratch_operands = 0 : i64, tpu.core_type = #tpu.core_type<tc>, window_params = [{pipeline_mode = #tpu.pipeline_mode<synchronous>, transform_indices = @transform_0, window_bounds = array<i64: 196, 512>}, {pipeline_mode = #tpu.pipeline_mode<synchronous>, transform_indices = @transform_1, window_bounds = array<i64: 1, 512>}, {pipeline_mode = #tpu.pipeline_mode<synchronous>, transform_indices = @transform_2, window_bounds = array<i64: 1, 512>}, {pipeline_mode = #tpu.pipeline_mode<synchronous>, transform_indices = @transform_3, window_bounds = array<i64: 196, 512>}]} {
    %c0 = arith.constant 0 : index
    %c0_0 = arith.constant 0 : index
    %0 = vector.load %arg1[%c0, %c0_0] : memref<196x512xf32, #tpu.memory_space<vmem>>, vector<196x512xf32>
    %cst = arith.constant dense<0.000000e+00> : vector<196xf32>
    %1 = vector.multi_reduction <add>, %0, %cst [1] : vector<196x512xf32> to vector<196xf32>
    %2 = vector.shape_cast %1 : vector<196xf32> to vector<196x1xf32>
    %cst_1 = arith.constant 5.120000e+02 : f32
    %3 = vector.broadcast %cst_1 : f32 to vector<196x1xf32>
    %4 = arith.divf %2, %3 : vector<196x1xf32>
    %5 = vector.broadcast %4 : vector<196x1xf32> to vector<196x512xf32>
    %6 = arith.subf %0, %5 : vector<196x512xf32>
    %7 = arith.mulf %6, %6 : vector<196x512xf32>
    %cst_2 = arith.constant dense<0.000000e+00> : vector<196xf32>
    %8 = vector.multi_reduction <add>, %7, %cst_2 [1] : vector<196x512xf32> to vector<196xf32>
    %9 = vector.shape_cast %8 : vector<196xf32> to vector<196x1xf32>
    %cst_3 = arith.constant 5.120000e+02 : f32
    %10 = vector.broadcast %cst_3 : f32 to vector<196x1xf32>
    %11 = arith.divf %9, %10 : vector<196x1xf32>
    %cst_4 = arith.constant 9.99999974E-6 : f32
    %12 = vector.broadcast %cst_4 : f32 to vector<196x1xf32>
    %13 = arith.addf %11, %12 : vector<196x1xf32>
    %14 = math.rsqrt %13 : vector<196x1xf32>
    %c0_5 = arith.constant 0 : index
    %c0_6 = arith.constant 0 : index
    %15 = vector.load %arg2[%c0_5, %c0_6] : memref<1x512xf32, #tpu.memory_space<vmem>>, vector<1x512xf32>
    %c0_7 = arith.constant 0 : index
    %c0_8 = arith.constant 0 : index
    %16 = vector.load %arg3[%c0_7, %c0_8] : memref<1x512xf32, #tpu.memory_space<vmem>>, vector<1x512xf32>
    %17 = vector.broadcast %14 : vector<196x1xf32> to vector<196x512xf32>
    %18 = arith.mulf %6, %17 : vector<196x512xf32>
    %19 = vector.broadcast %15 : vector<1x512xf32> to vector<196x512xf32>
    %20 = arith.mulf %18, %19 : vector<196x512xf32>
    %21 = vector.broadcast %16 : vector<1x512xf32> to vector<196x512xf32>
    %22 = arith.addf %20, %21 : vector<196x512xf32>
    %c0_9 = arith.constant 0 : index
    %c0_10 = arith.constant 0 : index
    %23 = vector.load %arg4[%c0_9, %c0_10] : memref<196x512xf32, #tpu.memory_space<vmem>>, vector<196x512xf32>
    tpu.vector_store %arg4[%c0_9, %c0_10], %22 {strides = array<i32>} : memref<196x512xf32, #tpu.memory_space<vmem>>, vector<196x512xf32>,
    return
  }
  func.func @transform_0(%arg0: i32) -> (i32, i32) {
    %c0_i32 = arith.constant 0 : i32
    %c0_i32_0 = arith.constant 0 : i32
    %c0_i32_1 = arith.constant 0 : i32
    return %c0_i32, %c0_i32_0 : i32, i32
  }
  func.func @transform_1(%arg0: i32) -> (i32, i32) {
    %c0_i32 = arith.constant 0 : i32
    %c0_i32_0 = arith.constant 0 : i32
    %c0_i32_1 = arith.constant 0 : i32
    return %c0_i32, %c0_i32_0 : i32, i32
  }
  func.func @transform_2(%arg0: i32) -> (i32, i32) {
    %c0_i32 = arith.constant 0 : i32
    %c0_i32_0 = arith.constant 0 : i32
    %c0_i32_1 = arith.constant 0 : i32
    return %c0_i32, %c0_i32_0 : i32, i32
  }
  func.func @transform_3(%arg0: i32) -> (i32, i32) {
    %c0_i32 = arith.constant 0 : i32
    %c0_i32_0 = arith.constant 0 : i32
    %c0_i32_1 = arith.constant 0 : i32
    return %c0_i32, %c0_i32_0 : i32, i32
  }
}

</mosaic_0001>

<bundles_post_ra>
// kernel: tpu_custom_call.1
= control target key start
LH: loop header
LB: loop body
LE: loop exit
PB: predicated region body
PF: predicated region fallthrough
CT: control target
= control target key end

     0   :  { %8 = vsyncpa [#allocation3], 0  ;;  %s2637_s0 = inlined_call_operand.hbm [shape: f32[196,512], index: 0, kind: input, shape index: {}]   ;;  %s2638_s1 = inlined_call_operand.hbm [shape: f32[1,512], index: 1, kind: input, shape index: {}]   ;;  %s2639_s2 = inlined_call_operand.hbm [shape: f32[1,512], index: 2, kind: input, shape index: {}]   ;;  %s2640_s3 = inlined_call_operand.hbm [shape: f32[196,512], index: 3, kind: output, shape index: {}]  }
   0x1   :  { %9 = vsyncpa [#allocation6], 0 }
   0x2   :  { %10 = vsyncpa [#allocation4], 0  ;;  %s1316_s12 = smov [#allocation5]   ;;  %s1317_s14 = smov [#allocation2]  }
   0x3   :  { %s29_s13 = sshll.u32 %s1316_s12, 4  ;;  %s16_s15 = sshll.u32 %s1317_s14, 4  ;;  %s30_s13 = int_to_ptr.vmem [resolvable:$true] %s29_s13  ;;  %s17_s15 = int_to_ptr.vmem [resolvable:$true] %s16_s15 }
   0x4   :  { %s1238_s16 = scalar_lea.vmem %s30_s13, 64  ;;  %p1243_p1 = scmp.lt.s32.totalorder %s30_s13, %s30_s13 }
   0x5   :  { %p1239_p0 = scmp.ne.s32.totalorder %s30_s13, %s1238_s16  ;;  %p1244_p2 = scmp.lt.s32.totalorder %s1238_s16, %s1238_s16 }
   0x7   :  { %p1245_p3 = por %p1244_p2, %p1243_p1 }
   0x9   :  { %p1246_p4 = pnand %p1245_p3, %p1239_p0 }
   0xb   :  { %1249 = shalt.err (!%p1246_p4)
}
   0xc   :  { %32 = dma.hbm_to_vmem [thread:$0]  %s2638_s1, 64, %s30_s13, [#allocation6]  }
   0xd   :  { %s1258_s19 = scalar_lea.vmem %s17_s15, 12800  ;;  %p1263_p6 = scmp.lt.s32.totalorder %s17_s15, %s17_s15 }
   0xe   :  { %p1259_p5 = scmp.ne.s32.totalorder %s17_s15, %s1258_s19  ;;  %p1264_p7 = scmp.lt.s32.totalorder %s1258_s19, %s1258_s19 }
  0x10   :  { %p1265_p8 = por %p1264_p7, %p1263_p6 }
  0x12   :  { %p1266_p9 = pnand %p1265_p8, %p1259_p5 }
  0x14   :  { %1269 = shalt.err (!%p1266_p9)
}
  0x15   :  { %s1318_s20 = smov 512   ;;  %s1319_s21 = smov 32  }
  0x16   :  { %22 = dma.hbm_to_vmem [thread:$0]  %s2637_s0, 12800, %s17_s15, [#allocation3], %s1318_s20, %s1318_s20, %s1319_s21  }
  0x17   :  { %s1320_s24 = smov [#allocation7]  }
  0x18   :  { %s39_s25 = sshll.u32 %s1320_s24, 4  ;;  %s40_s25 = int_to_ptr.vmem [resolvable:$true] %s39_s25 }
  0x19   :  { %s1278_s1 = scalar_lea.vmem %s40_s25, 64  ;;  %p1283_p11 = scmp.lt.s32.totalorder %s40_s25, %s40_s25 }
  0x1a   :  { %p1279_p10 = scmp.ne.s32.totalorder %s40_s25, %s1278_s1  ;;  %p1284_p12 = scmp.lt.s32.totalorder %s1278_s1, %s1278_s1 }
  0x1c   :  { %p1285_p13 = por %p1284_p12, %p1283_p11 }
  0x1e   :  { %p1286_p0 = pnand %p1285_p13, %p1279_p10 }
  0x20   :  { %1289 = shalt.err (!%p1286_p0)
}
  0x21   :  { %42 = dma.hbm_to_vmem [thread:$0]  %s2639_s2, 64, %s40_s25, [#allocation6]  }
  0x22   :  { %1310 = dma.done.wait [#allocation3], 12800  }
  0x23   :  { %1311 = vsyncadd [#allocation3], 4294954496 }
  0x24   :  { %1312 = dma.done.wait [#allocation6], 128  }
  0x25   :  { %1313 = vsyncadd [#allocation6], 4294967168  ;;  %v1354_v0 = vld [vmem:[#allocation2 + $0x20] sm:$0xff]  ;;  %v1356_v1 = vld [vmem:[#allocation2 + $0x28] sm:$0xff]  ;;  %vm272_vm0 = vcmask 1043456   ;;  %s1321_s0 = smov [#allocation8]  }
  0x26   :  { %v1358_v2 = vld [vmem:[#allocation2 + $0x30] sm:$0xff]  ;;  %v157_v3 = vadd.f32 %v1356_v1, %v1354_v0  ;;  %v1362_v4 = vld [vmem:[#allocation2] sm:$0xff]  ;;  %v1364_v5 = vld [vmem:[#allocation2 + $0x8] sm:$0xff]  ;;  %s1161_s2 = sshll.u32 %s1321_s0, 4  ;;  %s1162_s2 = int_to_ptr.vmem [resolvable:$true] %s1161_s2 }
  0x27   :  { %v1366_v6 = vld [vmem:[#allocation2 + $0x38] sm:$0xff]  ;;  %v1368_v7 = vld [vmem:[#allocation2 + $0x10] sm:$0xff]  ;;  %v152_v8 = vadd.f32 %v1364_v5, %v1362_v4  ;;  %v1372_v9 = vld [vmem:[#allocation2 + $0x40] sm:$0xff]  ;;  %s1290_s28 = scalar_lea.vmem %s1162_s2, 12800  ;;  %p1295_p2 = scmp.lt.s32.totalorder %s1162_s2, %s1162_s2 }
  0x28   :  { %v158_v10 = vadd.f32 %v157_v3, %v1358_v2  ;;  %v1375_v11 = vld [vmem:[#allocation2 + $0x18] sm:$0xff]  ;;  %v1377_v12 = vld [vmem:[#allocation2 + $0x48] sm:$0xff]  ;;  %v1379_v13 = vld [vmem:[#allocation2 + $0x50] sm:$0xff]  ;;  %p1291_p1 = scmp.ne.s32.totalorder %s1162_s2, %s1290_s28  ;;  %p1296_p3 = scmp.lt.s32.totalorder %s1290_s28, %s1290_s28 }
  0x29   :  { %v153_v14 = vadd.f32 %v152_v8, %v1368_v7  ;;  %v162_v15 = vadd.f32 %v1377_v12, %v1372_v9  ;;  %v1384_v16 = vld [vmem:[#allocation2 + $0x60] sm:$0xff]  ;;  %v1386_v17 = vld [vmem:[#allocation2 + $0x68] sm:$0xff]  ;;  %v1388_v18 = vld [vmem:[#allocation2 + $0x70] sm:$0xff] }
  0x2a   :  { %v159_v19 = vadd.f32 %v158_v10, %v1366_v6  ;;  %v1391_v20 = vld [vmem:[#allocation2 + $0x58] sm:$0xff]  ;;  %v167_v21 = vadd.f32 %v1386_v17, %v1384_v16  ;;  %v1395_v22 = vld [vmem:[#allocation2 + $0x80] sm:$0xff]  ;;  %v1397_v23 = vld [vmem:[#allocation2 + $0x88] sm:$0xff]  ;;  %p1297_p4 = por %p1296_p3, %p1295_p2 }
  0x2b   :  { %v154_v24 = vadd.f32 %v153_v14, %v1375_v11  ;;  %v163_v25 = vadd.f32 %v162_v15, %v1379_v13  ;;  %v1401_v26 = vld [vmem:[#allocation2 + $0x78] sm:$0xff]  ;;  %v1403_v27 = vld [vmem:[#allocation2 + $0x90] sm:$0xff]  ;;  %v172_v28 = vadd.f32 %v1397_v23, %v1395_v22  ;;  %v1407_v29 = vld [vmem:[#allocation2 + $0xa0] sm:$0xff] }
  0x2c   :  { %160 = vadd.xlane.f32.xlu1 %v159_v19  ;;  %v168_v30 = vadd.f32 %v167_v21, %v1388_v18  ;;  %v1410_v31 = vld [vmem:[#allocation2 + $0x98] sm:$0xff]  ;;  %v1412_v32 = vld [vmem:[#allocation2 + $0xa8] sm:$0xff]  ;;  %v1414_v33 = vld [vmem:[#allocation2 + $0xb0] sm:$0xff]  ;;  %p1298_p5 = pnand %p1297_p4, %p1291_p1 }
  0x2d   :  { %155 = vadd.xlane.f32.xlu0 %v154_v24  ;;  %v164_v34 = vadd.f32 %v163_v25, %v1391_v20  ;;  %v173_v35 = vadd.f32 %v172_v28, %v1403_v27  ;;  %v177_v36 = vadd.f32 %v1412_v32, %v1407_v29  ;;  %v1420_v37 = vld [vmem:[#allocation2 + $0xc0] sm:$0xff]  ;;  %v1422_v38 = vld [vmem:[#allocation2 + $0xc8] sm:$0xff]  ;;  %v1424_v39 = vld [vmem:[#allocation2 + $0xd0] sm:$0xff] }
  0x2e   :  { %v169_v40 = vadd.f32 %v168_v30, %v1401_v26  ;;  %v1427_v41 = vld [vmem:[#allocation2 + $0xb8] sm:$0xff]  ;;  %v182_v42 = vadd.f32 %v1422_v38, %v1420_v37  ;;  %v1431_v43 = vld [vmem:[#allocation2 + $0x300] sm:$0xf]  ;;  %v1433_v44 = vld [vmem:[#allocation2 + $0x308] sm:$0xf] }
  0x2f   :  { %v178_v45 = vadd.f32 %v177_v36, %v1414_v33  ;;  %v1436_v46 = vld [vmem:[#allocation2 + $0x310] sm:$0xf]  ;;  %v1438_v47 = vld [vmem:[#allocation2 + $0x318] sm:$0xf]  ;;  %v273_v48 = vsel %vm272_vm0, %v1431_v43, 0.0  ;;  %v274_v49 = vsel %vm272_vm0, %v1433_v44, 0.0  ;;  %v174_v50 = vadd.f32 %v173_v35, %v1410_v31 }
  0x30   :  { %2756 = vst [vmem:[#allocation12_spill] sm:$0xff] %v1436_v46  ;;  %2757 = vst [vmem:[#allocation13_spill] sm:$0xff] %v1438_v47  ;;  %165 = vadd.xlane.f32.xlu1 %v164_v34  ;;  %v1445_v51 = vld [vmem:[#allocation2 + $0xd8] sm:$0xff]  ;;  %v183_v52 = vadd.f32 %v182_v42, %v1424_v39  ;;  %v275_v53 = vadd.f32 %v274_v49, %v273_v48  ;;  %v276_v54 = vsel %vm272_vm0, %v1436_v46, 0.0  ;;  %v1450_v55 = vld [vmem:[#allocation2 + $0x100] sm:$0xff]  ;;  %v278_v63 = vsel %vm272_vm0, %v1438_v47, 0.0 }
  0x31   :  { %v1452_v56 = vld [vmem:[#allocation2 + $0x108] sm:$0xff]  ;;  %170 = vadd.xlane.f32.xlu0 %v169_v40  ;;  %v179_v57 = vadd.f32 %v178_v45, %v1427_v41  ;;  %v1455_v58 = vld [vmem:[#allocation2 + $0x110] sm:$0xff]  ;;  %v1459_v60 = vld [vmem:[#allocation2 + $0xe0] sm:$0xff] }
  0x32   :  { %v192_v59 = vadd.f32 %v1452_v56, %v1450_v55  ;;  %v1461_v61 = vld [vmem:[#allocation2 + $0xe8] sm:$0xff]  ;;  %v277_v62 = vadd.f32 %v276_v54, %v275_v53  ;;  %v1465_v3 = vld [vmem:[#allocation2 + $0xf0] sm:$0xff]  ;;  %v1469_v10 = vld [vmem:[#allocation2 + $0x140] sm:$0xff]  ;;  %v184_v15 = vadd.f32 %v183_v52, %v1445_v51 }
  0x33   :  { %2758 = vst [vmem:[#allocation14_spill] sm:$0xff] %v1465_v3  ;;  %v187_v8 = vadd.f32 %v1461_v61, %v1459_v60  ;;  %v1471_v14 = vld [vmem:[#allocation2 + $0x148] sm:$0xff]  ;;  %v1474_v19 = vld [vmem:[#allocation2 + $0x118] sm:$0xff]  ;;  %v1479_v25 = vld [vmem:[#allocation2 + $0x120] sm:$0xff] }
  0x34   :  { %175 = vadd.xlane.f32.xlu1 %v174_v50  ;;  %2759 = vst [vmem:[#allocation15_spill] sm:$0xff] %v1474_v19  ;;  %v193_v21 = vadd.f32 %v192_v59, %v1455_v58  ;;  %v202_v24 = vadd.f32 %v1471_v14, %v1469_v10  ;;  %v1481_v28 = vld [vmem:[#allocation2 + $0x128] sm:$0xff]  ;;  %v279_v30 = vadd.f32 %v278_v63, %v277_v62  ;;  %v1484_v35 = vld [vmem:[#allocation2 + $0x150] sm:$0xff]  ;;  %v1488_v40 = vld [vmem:[#allocation2 + $0x180] sm:$0xff] }
  0x35   :  { %180 = vadd.xlane.f32.xlu0 %v179_v57  ;;  %v188_v34 = vadd.f32 %v187_v8, %v1465_v3  ;;  %2760 = vst [vmem:[#allocation16_spill] sm:$0xff] %v1484_v35  ;;  %v197_v36 = vadd.f32 %v1481_v28, %v1479_v25  ;;  %v1490_v42 = vld [vmem:[#allocation2 + $0x188] sm:$0xff]  ;;  %v1492_v45 = vld [vmem:[#allocation2 + $0xf8] sm:$0xff]  ;;  %v1494_v48 = vld [vmem:[#allocation2 + $0x130] sm:$0xff] }
  0x36   :  { %2761 = vst [vmem:[#allocation17_spill] sm:$0xff] %v1492_v45  ;;  %2762 = vst [vmem:[#allocation18_spill] sm:$0xff] %v1494_v48  ;;  %v1496_v49 = vld [vmem:[#allocation2 + $0x160] sm:$0xff]  ;;  %v1498_v50 = vld [vmem:[#allocation2 + $0x168] sm:$0xff]  ;;  %v194_v52 = vadd.f32 %v193_v21, %v1474_v19  ;;  %v203_v54 = vadd.f32 %v202_v24, %v1484_v35  ;;  %v212_v59 = vadd.f32 %v1490_v42, %v1488_v40 }
  0x37   :  { %2763 = vst [vmem:[#allocation19_spill] sm:$0xff] %v1496_v49  ;;  %2764 = vst [vmem:[#allocation20_spill] sm:$0xff] %v1498_v50  ;;  %v1501_v53 = vld [vmem:[#allocation2 + $0x158] sm:$0xff]  ;;  %v189_v62 = vadd.f32 %v188_v34, %v1492_v45  ;;  %v198_v63 = vadd.f32 %v197_v36, %v1494_v48  ;;  %v1510_v8 = vld [vmem:[#allocation2 + $0x190] sm:$0xff] }
  0x38   :  { %185 = vadd.xlane.f32.xlu1 %v184_v15  ;;  %2765 = vst [vmem:[#allocation21_spill] sm:$0xff] %v1501_v53  ;;  %v1504_v57 = vld [vmem:[#allocation2 + $0x138] sm:$0xff]  ;;  %2767 = vst [vmem:[#allocation23_spill] sm:$0xff] %v1510_v8  ;;  %v207_v15 = vadd.f32 %v1498_v50, %v1496_v49  ;;  %v1514_v21 = vld [vmem:[#allocation2 + $0x1c0] sm:$0xff]  ;;  %v213_v36 = vadd.f32 %v212_v59, %v1510_v8 }
  0x39   :  { %2766 = vst [vmem:[#allocation22_spill] sm:$0xff] %v1504_v57  ;;  %280 = vadd.xlane.f32.xlu0 %v279_v30  ;;  %2768 = vst [vmem:[#allocation24_spill] sm:$0xff] %v1514_v21  ;;  %v1516_v47 = vld [vmem:[#allocation2 + $0x1c8] sm:$0xff]  ;;  %v1518_v24 = vld [vmem:[#allocation2 + $0x170] sm:$0xff]  ;;  %v204_v30 = vadd.f32 %v203_v54, %v1501_v53  ;;  %v199_v3 = vadd.f32 %v198_v63, %v1504_v57 }
  0x3a   :  { %2769 = vst [vmem:[#allocation25_spill] sm:$0xff] %v1516_v47  ;;  %2770 = vst [vmem:[#allocation26_spill] sm:$0xff] %v1518_v24  ;;  %v1520_v46 = vld [vmem:[#allocation2 + $0x1a0] sm:$0xff]  ;;  %v1522_v35 = vld [vmem:[#allocation2 + $0x1a8] sm:$0xff]  ;;  %v222_v45 = vadd.f32 %v1516_v47, %v1514_v21  ;;  %v208_v50 = vadd.f32 %v207_v15, %v1518_v24 }
  0x3b   :  { %2771 = vst [vmem:[#allocation27_spill] sm:$0xff] %v1520_v46  ;;  %2772 = vst [vmem:[#allocation28_spill] sm:$0xff] %v1522_v35  ;;  %v1525_v34 = vld [vmem:[#allocation2 + $0x198] sm:$0xff]  ;;  %v1534_v19 = vld [vmem:[#allocation2 + $0x1d0] sm:$0xff] }
  0x3c   :  { %195 = vadd.xlane.f32.xlu1 %v194_v52  ;;  %2773 = vst [vmem:[#allocation29_spill] sm:$0xff] %v1525_v34  ;;  %v1528_v48 = vld [vmem:[#allocation2 + $0x178] sm:$0xff]  ;;  %2775 = vst [vmem:[#allocation31_spill] sm:$0xff] %v1534_v19  ;;  %v217_v52 = vadd.f32 %v1522_v35, %v1520_v46  ;;  %v1538_v54 = vld [vmem:[#allocation2 + $0x200] sm:$0xff]  ;;  %v223_v15 = vadd.f32 %v222_v45, %v1534_v19 }
  0x3d   :  { %2774 = vst [vmem:[#allocation30_spill] sm:$0xff] %v1528_v48  ;;  %190 = vadd.xlane.f32.xlu0 %v189_v62  ;;  %2776 = vst [vmem:[#allocation32_spill] sm:$0xff] %v1538_v54  ;;  %v1540_v53 = vld [vmem:[#allocation2 + $0x208] sm:$0xff]  ;;  %v1542_v59 = vld [vmem:[#allocation2 + $0x1b0] sm:$0xff]  ;;  %v214_v62 = vadd.f32 %v213_v36, %v1525_v34  ;;  %v209_v35 = vadd.f32 %v208_v50, %v1528_v48 }
  0x3e   :  { %2777 = vst [vmem:[#allocation33_spill] sm:$0xff] %v1540_v53  ;;  %2778 = vst [vmem:[#allocation34_spill] sm:$0xff] %v1542_v59  ;;  %v1544_v8 = vld [vmem:[#allocation2 + $0x1e0] sm:$0xff]  ;;  %v1546_v49 = vld [vmem:[#allocation2 + $0x1e8] sm:$0xff]  ;;  %v232_v57 = vadd.f32 %v1540_v53, %v1538_v54  ;;  %v218_v46 = vadd.f32 %v217_v52, %v1542_v59 }
  0x3f   :  { %2779 = vst [vmem:[#allocation35_spill] sm:$0xff] %v1544_v8  ;;  %2780 = vst [vmem:[#allocation36_spill] sm:$0xff] %v1546_v49  ;;  %v1549_v63 = vld [vmem:[#allocation2 + $0x1d8] sm:$0xff]  ;;  %v1558_v47 = vld [vmem:[#allocation2 + $0x210] sm:$0xff] }
  0x40   :  { %205 = vadd.xlane.f32.xlu1 %v204_v30  ;;  %2781 = vst [vmem:[#allocation37_spill] sm:$0xff] %v1549_v63  ;;  %v1552_v24 = vld [vmem:[#allocation2 + $0x1b8] sm:$0xff]  ;;  %2783 = vst [vmem:[#allocation39_spill] sm:$0xff] %v1558_v47  ;;  %v227_v30 = vadd.f32 %v1546_v49, %v1544_v8  ;;  %v1562_v36 = vld [vmem:[#allocation2 + $0x240] sm:$0xff]  ;;  %v233_v52 = vadd.f32 %v232_v57, %v1558_v47 }
  0x41   :  { %2782 = vst [vmem:[#allocation38_spill] sm:$0xff] %v1552_v24  ;;  %200 = vadd.xlane.f32.xlu0 %v199_v3  ;;  %2784 = vst [vmem:[#allocation40_spill] sm:$0xff] %v1562_v36  ;;  %v1564_v34 = vld [vmem:[#allocation2 + $0x248] sm:$0xff]  ;;  %v1566_v45 = vld [vmem:[#allocation2 + $0x1f0] sm:$0xff]  ;;  %v224_v3 = vadd.f32 %v223_v15, %v1549_v63  ;;  %v219_v49 = vadd.f32 %v218_v46, %v1552_v24 }
  0x42   :  { %2785 = vst [vmem:[#allocation41_spill] sm:$0xff] %v1564_v34  ;;  %2786 = vst [vmem:[#allocation42_spill] sm:$0xff] %v1566_v45  ;;  %v1568_v19 = vld [vmem:[#allocation2 + $0x220] sm:$0xff]  ;;  %v1570_v21 = vld [vmem:[#allocation2 + $0x228] sm:$0xff]  ;;  %v242_v48 = vadd.f32 %v1564_v34, %v1562_v36  ;;  %v228_v8 = vadd.f32 %v227_v30, %v1566_v45 }
  0x43   :  { %2787 = vst [vmem:[#allocation43_spill] sm:$0xff] %v1568_v19  ;;  %2788 = vst [vmem:[#allocation44_spill] sm:$0xff] %v1570_v21  ;;  %v1573_v50 = vld [vmem:[#allocation2 + $0x218] sm:$0xff]  ;;  %v1582_v53 = vld [vmem:[#allocation2 + $0x250] sm:$0xff] }
  0x44   :  { %215 = vadd.xlane.f32.xlu1 %v214_v62  ;;  %2789 = vst [vmem:[#allocation45_spill] sm:$0xff] %v1573_v50  ;;  %v1576_v59 = vld [vmem:[#allocation2 + $0x1f8] sm:$0xff]  ;;  %2791 = vst [vmem:[#allocation47_spill] sm:$0xff] %v1582_v53  ;;  %v237_v62 = vadd.f32 %v1570_v21, %v1568_v19  ;;  %v1586_v15 = vld [vmem:[#allocation2 + $0x280] sm:$0xff]  ;;  %v234_v46 = vadd.f32 %v233_v52, %v1573_v50  ;;  %v243_v30 = vadd.f32 %v242_v48, %v1582_v53 }
  0x45   :  { %2790 = vst [vmem:[#allocation46_spill] sm:$0xff] %v1576_v59  ;;  %210 = vadd.xlane.f32.xlu0 %v209_v35  ;;  %v1588_v63 = vld [vmem:[#allocation2 + $0x288] sm:$0xff]  ;;  %v1590_v57 = vld [vmem:[#allocation2 + $0x230] sm:$0xff]  ;;  %v1592_v47 = vld [vmem:[#allocation2 + $0x260] sm:$0xff]  ;;  %v229_v21 = vadd.f32 %v228_v8, %v1576_v59 }
  0x46   :  { %2792 = vst [vmem:[#allocation48_spill] sm:$0xff] %v1588_v63  ;;  %2793 = vst [vmem:[#allocation49_spill] sm:$0xff] %v1590_v57  ;;  %v1594_v54 = vld [vmem:[#allocation2 + $0x268] sm:$0xff]  ;;  %v1597_v35 = vld [vmem:[#allocation2 + $0x258] sm:$0xff]  ;;  %v252_v24 = vadd.f32 %v1588_v63, %v1586_v15  ;;  %v238_v19 = vadd.f32 %v237_v62, %v1590_v57 }
  0x47   :  { %2794 = vst [vmem:[#allocation50_spill] sm:$0xff] %v1592_v47  ;;  %2795 = vst [vmem:[#allocation51_spill] sm:$0xff] %v1594_v54  ;;  %v1600_v45 = vld [vmem:[#allocation2 + $0x238] sm:$0xff]  ;;  %v1606_v34 = vld [vmem:[#allocation2 + $0x290] sm:$0xff] }
  0x48   :  { %225 = vadd.xlane.f32.xlu1 %v224_v3  ;;  %2796 = vst [vmem:[#allocation52_spill] sm:$0xff] %v1597_v35  ;;  %2797 = vst [vmem:[#allocation53_spill] sm:$0xff] %v1600_v45  ;;  %v247_v3 = vadd.f32 %v1594_v54, %v1592_v47  ;;  %v1610_v52 = vld [vmem:[#allocation2 + $0x2c0] sm:$0xff]  ;;  %v1612_v50 = vld [vmem:[#allocation2 + $0x2c8] sm:$0xff]  ;;  %v253_v8 = vadd.f32 %v252_v24, %v1606_v34  ;;  %v239_v57 = vadd.f32 %v238_v19, %v1600_v45 }
  0x49   :  { %220 = vadd.xlane.f32.xlu0 %v219_v49  ;;  %2798 = vst [vmem:[#allocation54_spill] sm:$0xff] %v1606_v34  ;;  %v1614_v48 = vld [vmem:[#allocation2 + $0x270] sm:$0xff]  ;;  %v1616_v53 = vld [vmem:[#allocation2 + $0x2a0] sm:$0xff]  ;;  %v1618_v36 = vld [vmem:[#allocation2 + $0x2a8] sm:$0xff]  ;;  %v244_v49 = vadd.f32 %v243_v30, %v1597_v35  ;;  %v262_v62 = vadd.f32 %v1612_v50, %v1610_v52 }
  0x4a   :  { %2799 = vst [vmem:[#allocation55_spill] sm:$0xff] %v1614_v48  ;;  %2800 = vst [vmem:[#allocation56_spill] sm:$0xff] %v1616_v53  ;;  %v1625_v59 = vld [vmem:[#allocation2 + $0x298] sm:$0xff]  ;;  %v248_v47 = vadd.f32 %v247_v3, %v1614_v48  ;;  %v1630_v63 = vld [vmem:[#allocation2 + $0x2d0] sm:$0xff] }
  0x4b   :  { %2801 = vst [vmem:[#allocation57_spill] sm:$0xff] %v1618_v36  ;;  %v1627_v54 = vld [vmem:[#allocation2 + $0x278] sm:$0xff]  ;;  %2803 = vst [vmem:[#allocation59_spill] sm:$0xff] %v1630_v63  ;;  %v1634_v30 = vld [vmem:[#allocation2 + $0x2b0] sm:$0xff]  ;;  %v254_v19 = vadd.f32 %v253_v8, %v1625_v59 }
  0x4c   :  { %235 = vadd.xlane.f32.xlu1 %v234_v46  ;;  %2802 = vst [vmem:[#allocation58_spill] sm:$0xff] %v1627_v54  ;;  %v257_v46 = vadd.f32 %v1618_v36, %v1616_v53  ;;  %2804 = vst [vmem:[#allocation60_spill] sm:$0xff] %v1634_v30  ;;  %v1636_v24 = vld [vmem:[#allocation2 + $0x2e0] sm:$0xff]  ;;  %v1638_v34 = vld [vmem:[#allocation2 + $0x2e8] sm:$0xff]  ;;  %v249_v45 = vadd.f32 %v248_v47, %v1627_v54 }
  0x4d   :  { %230 = vadd.xlane.f32.xlu0 %v229_v21  ;;  %v263_v21 = vadd.f32 %v262_v62, %v1630_v63  ;;  %v1643_v3 = vld [vmem:[#allocation2 + $0x2d8] sm:$0xff]  ;;  %v267_v35 = vadd.f32 %v1638_v34, %v1636_v24  ;;  %v1650_v53 = vld [vmem:[#allocation2 + $0x2f0] sm:$0xff] }
  0x4e   :  { %v258_v48 = vadd.f32 %v257_v46, %v1634_v30  ;;  %v1648_v36 = vld [vmem:[#allocation2 + $0x2b8] sm:$0xff] }
  0x4f   :  { %v1655_v47 = vld [vmem:[#allocation2 + $0x2f8] sm:$0xff] }
  0x50   :  { %245 = vadd.xlane.f32.xlu1 %v244_v49  ;;  %v264_v49 = vadd.f32 %v263_v21, %v1643_v3  ;;  %v259_v8 = vadd.f32 %v258_v48, %v1648_v36 }
  0x51   :  { %240 = vadd.xlane.f32.xlu0 %v239_v57  ;;  %v268_v57 = vadd.f32 %v267_v35, %v1650_v53 }
  0x53   :  { %v269_v62 = vadd.f32 %v268_v57, %v1655_v47 }
  0x54   :  { %255 = vadd.xlane.f32.xlu1 %v254_v19 }
  0x55   :  { %250 = vadd.xlane.f32.xlu0 %v249_v45 }
  0x58   :  { %265 = vadd.xlane.f32.xlu1 %v264_v49 }
  0x59   :  { %260 = vadd.xlane.f32.xlu0 %v259_v8 }
  0x5d   :  { %270 = vadd.xlane.f32.xlu0 %v269_v62 }
  0xb5   :  { %v161_v46 = vpop.xlane.xlu1 %160 }
  0xb6   :  { %v284_v30 = vmul.f32 0.001953125, %v161_v46  ;;  %v156_v63 = vpop.xlane.xlu0 %155 }
  0xb7   :  { %v283_v54 = vmul.f32 0.001953125, %v156_v63 }
  0xb8   :  { %v1659_v19 = vsub.f32 %v1354_v0, %v284_v30  ;;  %v1662_v45 = vsub.f32 %v1356_v1, %v284_v30  ;;  %v1665_v48 = vsub.f32 %v1358_v2, %v284_v30  ;;  %v1668_v35 = vsub.f32 %v1366_v6, %v284_v30 }
  0xb9   :  { %v1671_v21 = vsub.f32 %v1362_v4, %v283_v54  ;;  %v1674_v49 = vsub.f32 %v1364_v5, %v283_v54  ;;  %v166_v8 = vpop.xlane.xlu1 %165  ;;  %v1677_v63 = vsub.f32 %v1368_v7, %v283_v54  ;;  %v1680_v0 = vsub.f32 %v1375_v11, %v283_v54 }
  0xba   :  { %2805 = vst [vmem:[#allocation61_spill] sm:$0xff] %v1659_v19  ;;  %2806 = vst [vmem:[#allocation62_spill] sm:$0xff] %v1662_v45  ;;  %v285_v1 = vmul.f32 0.001953125, %v166_v8  ;;  %v171_v57 = vpop.xlane.xlu0 %170  ;;  %v412_v2 = vmul.f32 %v1659_v19, %v1659_v19  ;;  %v413_v6 = vmul.f32 %v1662_v45, %v1662_v45  ;;  %v414_v4 = vmul.f32 %v1665_v48, %v1665_v48 }
  0xbb   :  { %2807 = vst [vmem:[#allocation63_spill] sm:$0xff] %v1665_v48  ;;  %2808 = vst [vmem:[#allocation64_spill] sm:$0xff] %v1668_v35  ;;  %v286_v5 = vmul.f32 0.001953125, %v171_v57  ;;  %v415_v30 = vmul.f32 %v1668_v35, %v1668_v35  ;;  %v408_v7 = vmul.f32 %v1671_v21, %v1671_v21  ;;  %v409_v11 = vmul.f32 %v1674_v49, %v1674_v49 }
  0xbc   :  { %2809 = vst [vmem:[#allocation65_spill] sm:$0xff] %v1671_v21  ;;  %2810 = vst [vmem:[#allocation66_spill] sm:$0xff] %v1674_v49  ;;  %v1695_v54 = vsub.f32 %v1372_v9, %v285_v1  ;;  %v1698_v62 = vsub.f32 %v1377_v12, %v285_v1  ;;  %v513_v46 = vadd.f32 %v413_v6, %v412_v2 }
  0xbd   :  { %2811 = vst [vmem:[#allocation67_spill] sm:$0xff] %v1677_v63  ;;  %2812 = vst [vmem:[#allocation68_spill] sm:$0xff] %v1680_v0  ;;  %v410_v8 = vmul.f32 %v1677_v63, %v1677_v63  ;;  %v1703_v57 = vsub.f32 %v1384_v16, %v286_v5  ;;  %v1706_v35 = vsub.f32 %v1386_v17, %v286_v5  ;;  %v176_v21 = vpop.xlane.xlu1 %175 }
  0xbe   :  { %v411_v49 = vmul.f32 %v1680_v0, %v1680_v0  ;;  %v508_v48 = vadd.f32 %v409_v11, %v408_v7  ;;  %v287_v9 = vmul.f32 0.001953125, %v176_v21  ;;  %v181_v45 = vpop.xlane.xlu0 %180  ;;  %v514_v19 = vadd.f32 %v513_v46, %v414_v4 }
  0xbf   :  { %v1711_v12 = vsub.f32 %v1379_v13, %v285_v1  ;;  %v1714_v2 = vsub.f32 %v1391_v20, %v285_v1  ;;  %v288_v6 = vmul.f32 0.001953125, %v181_v45  ;;  %v416_v17 = vmul.f32 %v1695_v54, %v1695_v54 }
  0xc0   :  { %v509_v16 = vadd.f32 %v508_v48, %v410_v8  ;;  %v417_v63 = vmul.f32 %v1698_v62, %v1698_v62  ;;  %v1721_v0 = vsub.f32 %v1395_v22, %v287_v9  ;;  %v1724_v21 = vsub.f32 %v1397_v23, %v287_v9 }
  0xc1   :  { %v515_v4 = vadd.f32 %v514_v19, %v415_v30  ;;  %v1727_v13 = vsub.f32 %v1407_v29, %v288_v6  ;;  %v1730_v20 = vsub.f32 %v1412_v32, %v288_v6  ;;  %v186_v45 = vpop.xlane.xlu1 %185  ;;  %v418_v1 = vmul.f32 %v1711_v12, %v1711_v12 }
  0xc2   :  { %v510_v48 = vadd.f32 %v509_v16, %v411_v49  ;;  %v289_v7 = vmul.f32 0.001953125, %v186_v45  ;;  %v281_v11 = vpop.xlane.xlu0 %280  ;;  %v419_v22 = vmul.f32 %v1714_v2, %v1714_v2  ;;  %v518_v23 = vadd.f32 %v417_v63, %v416_v17 }
  0xc3   :  { %2813 = vst [vmem:[#allocation69_spill] sm:$0xff] %v1727_v13  ;;  %2814 = vst [vmem:[#allocation70_spill] sm:$0xff] %v1730_v20  ;;  %516 = vadd.xlane.f32.xlu0 %v515_v4  ;;  %v1737_v19 = vsub.f32 %v1388_v18, %v286_v5  ;;  %v1739_v29 = vmul.f32 0.001953125, %v281_v11  ;;  %v1742_v32 = vsub.f32 %v1401_v26, %v286_v5 }
  0xc4   :  { %511 = vadd.xlane.f32.xlu1 %v510_v48  ;;  %v420_v49 = vmul.f32 %v1703_v57, %v1703_v57  ;;  %v421_v30 = vmul.f32 %v1706_v35, %v1706_v35  ;;  %v1749_v46 = vsub.f32 %v1420_v37, %v289_v7  ;;  %v1752_v63 = vsub.f32 %v1422_v38, %v289_v7 }
  0xc5   :  { %v519_v18 = vadd.f32 %v518_v23, %v418_v1  ;;  %v1755_v8 = vsub.f32 %v1403_v27, %v287_v9  ;;  %v1759_v26 = vsub.f32 %v1431_v43, %v1739_v29  ;;  %v1763_v5 = vsub.f32 %v1433_v44, %v1739_v29  ;;  %v196_v16 = vpop.xlane.xlu1 %195 }
  0xc6   :  { %2815 = vst [vmem:[#allocation71_spill] sm:$0xff] %v1749_v46  ;;  %2816 = vst [vmem:[#allocation72_spill] sm:$0xff] %v1752_v63  ;;  %v422_v37 = vmul.f32 %v1737_v19, %v1737_v19  ;;  %v523_v17 = vadd.f32 %v421_v30, %v420_v49  ;;  %v291_v4 = vmul.f32 0.001953125, %v196_v16  ;;  %v191_v38 = vpop.xlane.xlu0 %190  ;;  %v1768_v48 = vsub.f32 %v1410_v31, %v287_v9 }
  0xc7   :  { %2817 = vst [vmem:[#allocation73_spill] sm:$0xff] %v1755_v8  ;;  %2818 = vst [vmem:[#allocation74_spill] sm:$0xff] %v1759_v26  ;;  %v520_v45 = vadd.f32 %v519_v18, %v419_v22  ;;  %v424_v27 = vmul.f32 %v1721_v0, %v1721_v0  ;;  %v290_v43 = vmul.f32 0.001953125, %v191_v38  ;;  %v423_v1 = vmul.f32 %v1742_v32, %v1742_v32 }
  0xc8   :  { %2819 = vst [vmem:[#allocation75_spill] sm:$0xff] %v1763_v5  ;;  %2820 = vst [vmem:[#allocation76_spill] sm:$0xff] %v1768_v48  ;;  %v524_v44 = vadd.f32 %v523_v17, %v422_v37  ;;  %v425_v11 = vmul.f32 %v1724_v21, %v1724_v21  ;;  %v1777_v23 = vsub.f32 %v1450_v55, %v291_v4 }
  0xc9   :  { %v1780_v49 = vsub.f32 %v1452_v56, %v291_v4  ;;  %521 = vadd.xlane.f32.xlu1 %v520_v45  ;;  %v426_v31 = vmul.f32 %v1755_v8, %v1755_v8  ;;  %v1785_v9 = vsub.f32 %v1414_v33, %v288_v6  ;;  %v1788_v22 = vsub.f32 %v1459_v60, %v290_v43  ;;  %v206_v18 = vpop.xlane.xlu1 %205 }
  0xca   :  { %2821 = vst [vmem:[#allocation77_spill] sm:$0xff] %v1777_v23  ;;  %v525_v30 = vadd.f32 %v524_v44, %v423_v1  ;;  %v427_v16 = vmul.f32 %v1768_v48, %v1768_v48  ;;  %v528_v55 = vadd.f32 %v425_v11, %v424_v27  ;;  %v1792_v37 = vmul.f32 0.001953125, %v206_v18  ;;  %v201_v56 = vpop.xlane.xlu0 %200 }
  0xcb   :  { %2822 = vst [vmem:[#allocation78_spill] sm:$0xff] %v1780_v49  ;;  %2823 = vst [vmem:[#allocation79_spill] sm:$0xff] %v1785_v9  ;;  %v1795_v17 = vsub.f32 %v1427_v41, %v288_v6  ;;  %v428_v38 = vmul.f32 %v1727_v13, %v1727_v13  ;;  %v429_v33 = vmul.f32 %v1730_v20, %v1730_v20  ;;  %v1804_v45 = vmul.f32 0.001953125, %v201_v56 }
  0xcc   :  { %2824 = vst [vmem:[#allocation80_spill] sm:$0xff] %v1788_v22  ;;  %v1802_v60 = vsub.f32 %v1461_v61, %v290_v43  ;;  %526 = vadd.xlane.f32.xlu0 %v525_v30  ;;  %v529_v1 = vadd.f32 %v528_v55, %v426_v31  ;;  %v1807_v27 = vsub.f32 %v1424_v39, %v289_v7 }
  0xcd   :  { %2825 = vst [vmem:[#allocation81_spill] sm:$0xff] %v1795_v17  ;;  %v1811_v41 = vsub.f32 %v1469_v10, %v1792_v37  ;;  %v1815_v6 = vsub.f32 %v1471_v14, %v1792_v37  ;;  %v430_v44 = vmul.f32 %v1785_v9, %v1785_v9  ;;  %v533_v61 = vadd.f32 %v429_v33, %v428_v38  ;;  %v216_v30 = vpop.xlane.xlu1 %215 }
  0xce   :  { %2826 = vst [vmem:[#allocation82_spill] sm:$0xff] %v1802_v60  ;;  %2827 = vst [vmem:[#allocation83_spill] sm:$0xff] %v1807_v27  ;;  %v1821_v11 = vsub.f32 %v1479_v25, %v1804_v45  ;;  %v530_v31 = vadd.f32 %v529_v1, %v427_v16  ;;  %v431_v39 = vmul.f32 %v1795_v17, %v1795_v17  ;;  %v1828_v55 = vmul.f32 0.001953125, %v216_v30  ;;  %v211_v14 = vpop.xlane.xlu0 %210 }
  0xcf   :  { %2828 = vst [vmem:[#allocation84_spill] sm:$0xff] %v1811_v41  ;;  %2829 = vst [vmem:[#allocation85_spill] sm:$0xff] %v1815_v6  ;;  %v1826_v10 = vsub.f32 %v1445_v51, %v289_v7  ;;  %v534_v18 = vadd.f32 %v533_v61, %v430_v44  ;;  %v432_v56 = vmul.f32 %v1749_v46, %v1749_v46  ;;  %v1838_v16 = vmul.f32 0.001953125, %v211_v14 }
  0xd0   :  { %2830 = vst [vmem:[#allocation86_spill] sm:$0xff] %v1821_v11  ;;  %v433_v38 = vmul.f32 %v1752_v63, %v1752_v63  ;;  %v1836_v25 = vsub.f32 %v1481_v28, %v1804_v45  ;;  %531 = vadd.xlane.f32.xlu1 %v530_v31  ;;  %v434_v51 = vmul.f32 %v1807_v27, %v1807_v27  ;;  %v2836_v31 = vld [vmem:[#allocation19_spill] sm:$0xff] }
  0xd1   :  { %2831 = vst [vmem:[#allocation87_spill] sm:$0xff] %v1826_v10  ;;  %v1843_v7 = vsub.f32 %v1455_v58, %v291_v4  ;;  %v535_v33 = vadd.f32 %v534_v18, %v431_v39  ;;  %v1847_v1 = vsub.f32 %v1488_v40, %v1828_v55  ;;  %v435_v44 = vmul.f32 %v1826_v10, %v1826_v10  ;;  %v226_v14 = vpop.xlane.xlu1 %225  ;;  %v2838_v58 = vld [vmem:[#allocation15_spill] sm:$0xff]  ;;  %v2840_v39 = vld [vmem:[#allocation20_spill] sm:$0xff] }
  0xd2   :  { %2832 = vst [vmem:[#allocation88_spill] sm:$0xff] %v1836_v25  ;;  %v538_v61 = vadd.f32 %v433_v38, %v432_v56  ;;  %v1853_v28 = vsub.f32 %v1490_v42, %v1828_v55  ;;  %v1857_v30 = vsub.f32 %v2836_v31, %v1838_v16  ;;  %v1860_v27 = vsub.f32 %v2838_v58, %v291_v4  ;;  %v221_v42 = vpop.xlane.xlu0 %220  ;;  %v2842_v58 = vld [vmem:[#allocation14_spill] sm:$0xff] }
  0xd3   :  { %2833 = vst [vmem:[#allocation89_spill] sm:$0xff] %v1843_v7  ;;  %2834 = vst [vmem:[#allocation90_spill] sm:$0xff] %v1847_v1  ;;  %v440_v40 = vmul.f32 %v1777_v23, %v1777_v23  ;;  %536 = vadd.xlane.f32.xlu0 %v535_v33  ;;  %v1866_v18 = vsub.f32 %v2840_v39, %v1838_v16  ;;  %v1868_v38 = vmul.f32 0.001953125, %v226_v14  ;;  %v1872_v10 = vmul.f32 0.001953125, %v221_v42  ;;  %v2844_v33 = vld [vmem:[#allocation17_spill] sm:$0xff] }
  0xd4   :  { %2835 = vst [vmem:[#allocation91_spill] sm:$0xff] %v1853_v28  ;;  %2837 = vst [vmem:[#allocation19_spill] sm:$0xff] %v1857_v30  ;;  %v539_v56 = vadd.f32 %v538_v61, %v434_v51  ;;  %v441_v31 = vmul.f32 %v1780_v49, %v1780_v49  ;;  %v442_v4 = vmul.f32 %v1843_v7, %v1843_v7  ;;  %v2846_v51 = vld [vmem:[#allocation24_spill] sm:$0xff]  ;;  %v2848_v42 = vld [vmem:[#allocation25_spill] sm:$0xff] }
  0xd5   :  { %2839 = vst [vmem:[#allocation15_spill] sm:$0xff] %v1860_v27  ;;  %2841 = vst [vmem:[#allocation20_spill] sm:$0xff] %v1866_v18  ;;  %v1877_v63 = vsub.f32 %v2842_v58, %v290_v43  ;;  %v1880_v23 = vsub.f32 %v2844_v33, %v290_v43  ;;  %v1884_v61 = vsub.f32 %v2846_v51, %v1868_v38  ;;  %v2850_v7 = vld [vmem:[#allocation27_spill] sm:$0xff]  ;;  %v2851_v33 = vld [vmem:[#allocation28_spill] sm:$0xff] }
  0xd6   :  { %v540_v39 = vadd.f32 %v539_v56, %v435_v44  ;;  %v443_v14 = vmul.f32 %v1860_v27, %v1860_v27  ;;  %v548_v49 = vadd.f32 %v441_v31, %v440_v40  ;;  %v1890_v46 = vsub.f32 %v2848_v42, %v1868_v38  ;;  %v236_v56 = vpop.xlane.xlu1 %235 }
  0xd7   :  { %2843 = vst [vmem:[#allocation14_spill] sm:$0xff] %v1877_v63  ;;  %2845 = vst [vmem:[#allocation17_spill] sm:$0xff] %v1880_v23  ;;  %v1894_v58 = vsub.f32 %v2850_v7, %v1872_v10  ;;  %v436_v43 = vmul.f32 %v1788_v22, %v1788_v22  ;;  %v437_v44 = vmul.f32 %v1802_v60, %v1802_v60  ;;  %v1906_v42 = vmul.f32 0.001953125, %v236_v56  ;;  %v231_v7 = vpop.xlane.xlu0 %230  ;;  %v2852_v60 = vld [vmem:[#allocation16_spill] sm:$0xff] }
  0xd8   :  { %2847 = vst [vmem:[#allocation24_spill] sm:$0xff] %v1884_v61  ;;  %2849 = vst [vmem:[#allocation25_spill] sm:$0xff] %v1890_v46  ;;  %541 = vadd.xlane.f32.xlu1 %v540_v39  ;;  %v1902_v51 = vsub.f32 %v2851_v33, %v1872_v10  ;;  %v549_v40 = vadd.f32 %v548_v49, %v442_v4  ;;  %v438_v31 = vmul.f32 %v1877_v63, %v1877_v63  ;;  %v2854_v33 = vld [vmem:[#allocation32_spill] sm:$0xff]  ;;  %v2855_v4 = vld [vmem:[#allocation21_spill] sm:$0xff] }
  0xd9   :  { %v439_v27 = vmul.f32 %v1880_v23, %v1880_v23  ;;  %v543_v22 = vadd.f32 %v437_v44, %v436_v43  ;;  %v1910_v17 = vmul.f32 0.001953125, %v231_v7  ;;  %v1914_v39 = vsub.f32 %v2852_v60, %v1792_v37  ;;  %v2857_v43 = vld [vmem:[#allocation33_spill] sm:$0xff]  ;;  %v2859_v60 = vld [vmem:[#allocation35_spill] sm:$0xff] }
  0xda   :  { %v550_v9 = vadd.f32 %v549_v40, %v443_v14  ;;  %v1918_v49 = vsub.f32 %v2854_v33, %v1906_v42  ;;  %v1922_v56 = vsub.f32 %v2855_v4, %v1792_v37  ;;  %v448_v63 = vmul.f32 %v1811_v41, %v1811_v41  ;;  %v246_v40 = vpop.xlane.xlu1 %245  ;;  %v2860_v37 = vld [vmem:[#allocation36_spill] sm:$0xff] }
  0xdb   :  { %2853 = vst [vmem:[#allocation27_spill] sm:$0xff] %v1914_v39  ;;  %v544_v23 = vadd.f32 %v543_v22, %v438_v31  ;;  %v1928_v44 = vsub.f32 %v2857_v43, %v1906_v42  ;;  %v1932_v7 = vsub.f32 %v2859_v60, %v1910_v17  ;;  %v449_v14 = vmul.f32 %v1815_v6, %v1815_v6  ;;  %v2862_v31 = vld [vmem:[#allocation18_spill] sm:$0xff]  ;;  %v241_v41 = vpop.xlane.xlu0 %240 }
  0xdc   :  { %2856 = vst [vmem:[#allocation28_spill] sm:$0xff] %v1922_v56  ;;  %551 = vadd.xlane.f32.xlu1 %v550_v9  ;;  %v1938_v33 = vsub.f32 %v2860_v37, %v1910_v17  ;;  %v450_v22 = vmul.f32 %v1914_v39, %v1914_v39  ;;  %v1944_v4 = vsub.f32 %v2862_v31, %v1804_v45  ;;  %v2864_v43 = vld [vmem:[#allocation22_spill] sm:$0xff]  ;;  %v1958_v13 = vmul.f32 0.001953125, %v246_v40 }
  0xdd   :  { %2858 = vst [vmem:[#allocation16_spill] sm:$0xff] %v1928_v44  ;;  %v1948_v60 = vsub.f32 %v2864_v43, %v1804_v45  ;;  %v545_v20 = vadd.f32 %v544_v23, %v439_v27  ;;  %v558_v6 = vadd.f32 %v449_v14, %v448_v63  ;;  %v444_v9 = vmul.f32 %v1821_v11, %v1821_v11  ;;  %v2866_v27 = vld [vmem:[#allocation23_spill] sm:$0xff]  ;;  %v2868_v43 = vld [vmem:[#allocation40_spill] sm:$0xff] }
  0xde   :  { %2861 = vst [vmem:[#allocation32_spill] sm:$0xff] %v1938_v33  ;;  %2863 = vst [vmem:[#allocation21_spill] sm:$0xff] %v1944_v4  ;;  %v445_v37 = vmul.f32 %v1836_v25, %v1836_v25  ;;  %v451_v39 = vmul.f32 %v1922_v56, %v1922_v56  ;;  %v446_v31 = vmul.f32 %v1944_v4, %v1944_v4  ;;  %v1960_v48 = vmul.f32 0.001953125, %v241_v41  ;;  %v2870_v4 = vld [vmem:[#allocation41_spill] sm:$0xff]  ;;  %v2872_v41 = vld [vmem:[#allocation43_spill] sm:$0xff] }
  0xdf   :  { %2865 = vst [vmem:[#allocation33_spill] sm:$0xff] %v1948_v60  ;;  %546 = vadd.xlane.f32.xlu0 %v545_v20  ;;  %v559_v45 = vadd.f32 %v558_v6, %v450_v22  ;;  %v447_v63 = vmul.f32 %v1948_v60, %v1948_v60  ;;  %v1966_v14 = vsub.f32 %v2866_v27, %v1828_v55  ;;  %v2873_v6 = vld [vmem:[#allocation29_spill] sm:$0xff]  ;;  %v256_v60 = vpop.xlane.xlu1 %255  ;;  %v251_v11 = vpop.xlane.xlu0 %250 }
  0xe0   :  { %v553_v23 = vadd.f32 %v445_v37, %v444_v9  ;;  %v1970_v25 = vsub.f32 %v2868_v43, %v1958_v13  ;;  %v1974_v40 = vsub.f32 %v2870_v4, %v1958_v13  ;;  %v1978_v20 = vsub.f32 %v2872_v41, %v1960_v48  ;;  %v2874_v4 = vld [vmem:[#allocation44_spill] sm:$0xff] }
  0xe1   :  { %2867 = vst [vmem:[#allocation35_spill] sm:$0xff] %v1966_v14  ;;  %v1982_v22 = vsub.f32 %v2873_v6, %v1828_v55  ;;  %v560_v9 = vadd.f32 %v559_v45, %v451_v39  ;;  %v456_v27 = vmul.f32 %v1847_v1, %v1847_v1  ;;  %v457_v43 = vmul.f32 %v1853_v28, %v1853_v28  ;;  %v2875_v55 = vld [vmem:[#allocation26_spill] sm:$0xff] }
  0xe2   :  { %2869 = vst [vmem:[#allocation36_spill] sm:$0xff] %v1970_v25  ;;  %2871 = vst [vmem:[#allocation18_spill] sm:$0xff] %v1974_v40  ;;  %v554_v37 = vadd.f32 %v553_v23, %v446_v31  ;;  %v1990_v56 = vsub.f32 %v2874_v4, %v1960_v48  ;;  %v458_v41 = vmul.f32 %v1966_v14, %v1966_v14  ;;  %v2877_v39 = vld [vmem:[#allocation30_spill] sm:$0xff]  ;;  %v2010_v1 = vmul.f32 0.001953125, %v256_v60 }
  0xe3   :  { %v1996_v6 = vsub.f32 %v2875_v55, %v1838_v16  ;;  %v2000_v31 = vsub.f32 %v2877_v39, %v1838_v16  ;;  %561 = vadd.xlane.f32.xlu1 %v560_v9  ;;  %v568_v23 = vadd.f32 %v457_v43, %v456_v27  ;;  %v452_v28 = vmul.f32 %v1857_v30, %v1857_v30  ;;  %v2882_v39 = vld [vmem:[#allocation48_spill] sm:$0xff] }
  0xe4   :  { %v555_v45 = vadd.f32 %v554_v37, %v447_v63  ;;  %v453_v4 = vmul.f32 %v1866_v18, %v1866_v18  ;;  %v459_v14 = vmul.f32 %v1982_v22, %v1982_v22  ;;  %v2012_v8 = vmul.f32 0.001953125, %v251_v11  ;;  %v2879_v37 = vld [vmem:[#allocation31_spill] sm:$0xff]  ;;  %v2884_v11 = vld [vmem:[#allocation50_spill] sm:$0xff] }
  0xe5   :  { %2876 = vst [vmem:[#allocation22_spill] sm:$0xff] %v1996_v6  ;;  %2878 = vst [vmem:[#allocation23_spill] sm:$0xff] %v2000_v31  ;;  %v454_v55 = vmul.f32 %v1996_v6, %v1996_v6  ;;  %v569_v16 = vadd.f32 %v568_v23, %v458_v41  ;;  %v455_v63 = vmul.f32 %v2000_v31, %v2000_v31  ;;  %v2885_v41 = vld [vmem:[#allocation37_spill] sm:$0xff]  ;;  %v266_v31 = vpop.xlane.xlu1 %265  ;;  %v261_v6 = vpop.xlane.xlu0 %260 }
  0xe6   :  { %556 = vadd.xlane.f32.xlu0 %v555_v45  ;;  %v563_v9 = vadd.f32 %v453_v4, %v452_v28  ;;  %v2018_v27 = vsub.f32 %v2879_v37, %v1868_v38  ;;  %v2022_v43 = vsub.f32 %v1586_v15, %v2010_v1  ;;  %v2026_v60 = vsub.f32 %v2882_v39, %v2010_v1  ;;  %v2886_v39 = vld [vmem:[#allocation51_spill] sm:$0xff] }
  0xe7   :  { %v2030_v45 = vsub.f32 %v2884_v11, %v2012_v8  ;;  %v2034_v23 = vsub.f32 %v2885_v41, %v1868_v38  ;;  %v570_v28 = vadd.f32 %v569_v16, %v459_v14  ;;  %v464_v37 = vmul.f32 %v1884_v61, %v1884_v61  ;;  %v2887_v38 = vld [vmem:[#allocation34_spill] sm:$0xff] }
  0xe8   :  { %2880 = vst [vmem:[#allocation40_spill] sm:$0xff] %v2018_v27  ;;  %2881 = vst [vmem:[#allocation41_spill] sm:$0xff] %v2022_v43  ;;  %v564_v4 = vadd.f32 %v563_v9, %v454_v55  ;;  %v465_v15 = vmul.f32 %v1890_v46, %v1890_v46  ;;  %v2042_v18 = vsub.f32 %v2886_v39, %v2012_v8  ;;  %v2889_v14 = vld [vmem:[#allocation38_spill] sm:$0xff]  ;;  %v2062_v61 = vmul.f32 0.001953125, %v266_v31 }
  0xe9   :  { %2883 = vst [vmem:[#allocation43_spill] sm:$0xff] %v2026_v60  ;;  %v466_v11 = vmul.f32 %v2018_v27, %v2018_v27  ;;  %v2048_v41 = vsub.f32 %v2887_v38, %v1872_v10  ;;  %v2052_v55 = vsub.f32 %v2889_v14, %v1872_v10  ;;  %571 = vadd.xlane.f32.xlu1 %v570_v28  ;;  %v2064_v30 = vmul.f32 0.001953125, %v261_v6  ;;  %v2893_v6 = vld [vmem:[#allocation56_spill] sm:$0xff] }
  0xea   :  { %v565_v16 = vadd.f32 %v564_v4, %v455_v63  ;;  %v578_v9 = vadd.f32 %v465_v15, %v464_v37  ;;  %v460_v46 = vmul.f32 %v1894_v58, %v1894_v58  ;;  %v461_v39 = vmul.f32 %v1902_v51, %v1902_v51  ;;  %v2891_v4 = vld [vmem:[#allocation39_spill] sm:$0xff] }
  0xeb   :  { %2888 = vst [vmem:[#allocation29_spill] sm:$0xff] %v2048_v41  ;;  %2890 = vst [vmem:[#allocation44_spill] sm:$0xff] %v2052_v55  ;;  %v467_v27 = vmul.f32 %v2034_v23, %v2034_v23  ;;  %v462_v38 = vmul.f32 %v2048_v41, %v2048_v41  ;;  %v463_v63 = vmul.f32 %v2052_v55, %v2052_v55  ;;  %v2897_v41 = vld [vmem:[#allocation42_spill] sm:$0xff] }
  0xec   :  { %566 = vadd.xlane.f32.xlu0 %v565_v16  ;;  %v579_v10 = vadd.f32 %v578_v9, %v466_v11  ;;  %v573_v28 = vadd.f32 %v461_v39, %v460_v46  ;;  %v2070_v37 = vsub.f32 %v2891_v4, %v1906_v42  ;;  %v2074_v15 = vsub.f32 %v1610_v52, %v2062_v61  ;;  %v2894_v11 = vld [vmem:[#allocation45_spill] sm:$0xff]  ;;  %v271_v4 = vpop.xlane.xlu0 %270 }
  0xed   :  { %v2078_v31 = vsub.f32 %v1612_v50, %v2062_v61  ;;  %v2082_v14 = vsub.f32 %v2893_v6, %v2064_v30  ;;  %v2086_v16 = vsub.f32 %v2894_v11, %v1906_v42  ;;  %v472_v39 = vmul.f32 %v1918_v49, %v1918_v49  ;;  %v2895_v50 = vld [vmem:[#allocation57_spill] sm:$0xff] }
  0xee   :  { %2892 = vst [vmem:[#allocation26_spill] sm:$0xff] %v2070_v37  ;;  %v580_v46 = vadd.f32 %v579_v10, %v467_v27  ;;  %v574_v9 = vadd.f32 %v573_v28, %v462_v38  ;;  %v473_v52 = vmul.f32 %v1928_v44, %v1928_v44  ;;  %v2094_v55 = vsub.f32 %v2895_v50, %v2064_v30  ;;  %v2898_v27 = vld [vmem:[#allocation46_spill] sm:$0xff] }
  0xef   :  { %v474_v6 = vmul.f32 %v2070_v37, %v2070_v37  ;;  %v2100_v42 = vsub.f32 %v2897_v41, %v1910_v17  ;;  %v2104_v38 = vsub.f32 %v2898_v27, %v1910_v17  ;;  %v468_v11 = vmul.f32 %v1932_v7, %v1932_v7  ;;  %v2899_v17 = vld [vmem:[#allocation47_spill] sm:$0xff] }
  0xf0   :  { %2896 = vst [vmem:[#allocation30_spill] sm:$0xff] %v2094_v55  ;;  %581 = vadd.xlane.f32.xlu1 %v580_v46  ;;  %v575_v10 = vadd.f32 %v574_v9, %v463_v63  ;;  %v588_v28 = vadd.f32 %v473_v52, %v472_v39  ;;  %v469_v50 = vmul.f32 %v1938_v33, %v1938_v33  ;;  %v2114_v44 = vmul.f32 0.001953125, %v271_v4  ;;  %v2900_v9 = vld [vmem:[#allocation52_spill] sm:$0xff] }
  0xf1   :  { %v475_v37 = vmul.f32 %v2086_v16, %v2086_v16  ;;  %v470_v41 = vmul.f32 %v2100_v42, %v2100_v42  ;;  %v2118_v27 = vsub.f32 %v2899_v17, %v1958_v13  ;;  %v2122_v39 = vsub.f32 %v2900_v9, %v1958_v13 }
  0xf2   :  { %576 = vadd.xlane.f32.xlu0 %v575_v10  ;;  %v589_v63 = vadd.f32 %v588_v28, %v474_v6  ;;  %v583_v46 = vadd.f32 %v469_v50, %v468_v11  ;;  %v480_v52 = vmul.f32 %v1970_v25, %v1970_v25  ;;  %v471_v33 = vmul.f32 %v2104_v38, %v2104_v38  ;;  %v2903_v11 = vld [vmem:[#allocation49_spill] sm:$0xff] }
  0xf3   :  { %v2130_v4 = vsub.f32 %v1636_v24, %v2114_v44  ;;  %v2134_v17 = vsub.f32 %v1638_v34, %v2114_v44  ;;  %v481_v6 = vmul.f32 %v1974_v40, %v1974_v40  ;;  %v482_v28 = vmul.f32 %v2118_v27, %v2118_v27  ;;  %v2904_v24 = vld [vmem:[#allocation53_spill] sm:$0xff] }
  0xf4   :  { %v590_v10 = vadd.f32 %v589_v63, %v475_v37  ;;  %v584_v13 = vadd.f32 %v583_v46, %v470_v41  ;;  %v2142_v50 = vsub.f32 %v2903_v11, %v1960_v48  ;;  %v2146_v25 = vsub.f32 %v2904_v24, %v1960_v48  ;;  %v2905_v63 = vld [vmem:[#allocation54_spill] sm:$0xff] }
  0xf5   :  { %2901 = vst [vmem:[#allocation31_spill] sm:$0xff] %v2130_v4  ;;  %2902 = vst [vmem:[#allocation48_spill] sm:$0xff] %v2134_v17  ;;  %v598_v9 = vadd.f32 %v481_v6, %v480_v52  ;;  %v476_v34 = vmul.f32 %v1978_v20, %v1978_v20  ;;  %v477_v40 = vmul.f32 %v1990_v56, %v1990_v56 }
  0xf6   :  { %591 = vadd.xlane.f32.xlu1 %v590_v10  ;;  %v585_v37 = vadd.f32 %v584_v13, %v471_v33  ;;  %v483_v41 = vmul.f32 %v2122_v39, %v2122_v39  ;;  %v2156_v46 = vsub.f32 %v2905_v63, %v2010_v1  ;;  %v2160_v52 = vsub.f32 %v1625_v59, %v2010_v1  ;;  %v2907_v59 = vld [vmem:[#allocation55_spill] sm:$0xff] }
  0xf7   :  { %v599_v48 = vadd.f32 %v598_v9, %v482_v28  ;;  %v478_v6 = vmul.f32 %v2142_v50, %v2142_v50  ;;  %v593_v11 = vadd.f32 %v477_v40, %v476_v34  ;;  %v488_v10 = vmul.f32 %v2022_v43, %v2022_v43  ;;  %v2908_v40 = vld [vmem:[#allocation58_spill] sm:$0xff]  ;;  %v2909_v43 = vld [vmem:[#allocation59_spill] sm:$0xff] }
  0xf8   :  { %2906 = vst [vmem:[#allocation50_spill] sm:$0xff] %v2156_v46  ;;  %586 = vadd.xlane.f32.xlu0 %v585_v37  ;;  %v479_v33 = vmul.f32 %v2146_v25, %v2146_v25  ;;  %v489_v13 = vmul.f32 %v2026_v60, %v2026_v60  ;;  %v490_v24 = vmul.f32 %v2156_v46, %v2156_v46 }
  0xf9   :  { %v2174_v1 = vsub.f32 %v2907_v59, %v2012_v8  ;;  %v600_v28 = vadd.f32 %v599_v48, %v483_v41  ;;  %v594_v9 = vadd.f32 %v593_v11, %v478_v6  ;;  %v2178_v34 = vsub.f32 %v2908_v40, %v2012_v8 }
  0xfa   :  { %v484_v37 = vmul.f32 %v2030_v45, %v2030_v45  ;;  %v491_v63 = vmul.f32 %v2160_v52, %v2160_v52  ;;  %v608_v60 = vadd.f32 %v489_v13, %v488_v10  ;;  %v485_v46 = vmul.f32 %v2042_v18, %v2042_v18 }
  0xfb   :  { %v2188_v59 = vsub.f32 %v2909_v43, %v2062_v61  ;;  %601 = vadd.xlane.f32.xlu1 %v600_v28  ;;  %v595_v41 = vadd.f32 %v594_v9, %v479_v33  ;;  %v486_v8 = vmul.f32 %v2174_v1, %v2174_v1  ;;  %v2194_v48 = vsub.f32 %v1643_v3, %v2062_v61  ;;  %v2911_v28 = vld [vmem:[#allocation60_spill] sm:$0xff] }
  0xfc   :  { %v496_v6 = vmul.f32 %v2074_v15, %v2074_v15  ;;  %v609_v11 = vadd.f32 %v608_v60, %v490_v24  ;;  %v487_v10 = vmul.f32 %v2178_v34, %v2178_v34  ;;  %v603_v13 = vadd.f32 %v485_v46, %v484_v37 }
  0xfd   :  { %2910 = vst [vmem:[#allocation37_spill] sm:$0xff] %v2188_v59  ;;  %v497_v43 = vmul.f32 %v2078_v31, %v2078_v31  ;;  %596 = vadd.xlane.f32.xlu0 %v595_v41  ;;  %v498_v33 = vmul.f32 %v2188_v59, %v2188_v59  ;;  %v2206_v9 = vsub.f32 %v2911_v28, %v2064_v30  ;;  %v2914_v28 = vld [vmem:[#allocation12_spill] sm:$0xff] }
  0xfe   :  { %v2210_v3 = vsub.f32 %v1648_v36, %v2064_v30  ;;  %v492_v61 = vmul.f32 %v2082_v14, %v2082_v14  ;;  %v610_v60 = vadd.f32 %v609_v11, %v491_v63  ;;  %v604_v46 = vadd.f32 %v603_v13, %v486_v8  ;;  %v2916_v36 = vld [vmem:[#allocation13_spill] sm:$0xff] }
  0xff   :  { %2912 = vst [vmem:[#allocation51_spill] sm:$0xff] %v2206_v9  ;;  %v618_v24 = vadd.f32 %v497_v43, %v496_v6  ;;  %v493_v40 = vmul.f32 %v2094_v55, %v2094_v55  ;;  %v499_v37 = vmul.f32 %v2194_v48, %v2194_v48  ;;  %v494_v41 = vmul.f32 %v2206_v9, %v2206_v9  ;;  %v2927_v55 = vld [vmem:[#allocation68_spill] sm:$0xff] }
 0x100   :  { %2913 = vst [vmem:[#allocation34_spill] sm:$0xff] %v2210_v3  ;;  %v2222_v59 = vsub.f32 %v2914_v28, %v1739_v29  ;;  %v2226_v30 = vsub.f32 %v2916_v36, %v1739_v29  ;;  %611 = vadd.xlane.f32.xlu1 %v610_v60  ;;  %v605_v63 = vadd.f32 %v604_v46, %v487_v10 }
 0x101   :  { %v619_v8 = vadd.f32 %v618_v24, %v498_v33  ;;  %v613_v6 = vadd.f32 %v493_v40, %v492_v61  ;;  %v504_v11 = vmul.f32 %v1759_v26, %v1759_v26  ;;  %v495_v13 = vmul.f32 %v2210_v3, %v2210_v3  ;;  %v2926_v3 = vld [vmem:[#allocation67_spill] sm:$0xff] }
 0x102   :  { %2915 = vst [vmem:[#allocation38_spill] sm:$0xff] %v2222_v59  ;;  %2917 = vst [vmem:[#allocation39_spill] sm:$0xff] %v2226_v30  ;;  %v505_v43 = vmul.f32 %v1763_v5, %v1763_v5  ;;  %v506_v28 = vmul.f32 %v2222_v59, %v2222_v59  ;;  %606 = vadd.xlane.f32.xlu0 %v605_v63  ;;  %v2239_v10 = vsub.f32 %v1650_v53, %v2114_v44 }
 0x103   :  { %v620_v9 = vadd.f32 %v619_v8, %v499_v37  ;;  %v614_v29 = vadd.f32 %v613_v6, %v494_v41  ;;  %v628_v60 = vsel %vm272_vm0, %v504_v11, 0.0  ;;  %v507_v33 = vmul.f32 %v2226_v30, %v2226_v30 }
 0x104   :  { %2918 = vst [vmem:[#allocation56_spill] sm:$0xff] %v2239_v10  ;;  %v629_v61 = vsel %vm272_vm0, %v505_v43, 0.0  ;;  %v500_v46 = vmul.f32 %v2130_v4, %v2130_v4  ;;  %v2248_v37 = vsub.f32 %v1655_v47, %v2114_v44  ;;  %v501_v41 = vmul.f32 %v2134_v17, %v2134_v17  ;;  %v2922_v4 = vld [vmem:[#allocation63_spill] sm:$0xff] }
 0x105   :  { %621 = vadd.xlane.f32.xlu1 %v620_v9  ;;  %v615_v24 = vadd.f32 %v614_v29, %v495_v13  ;;  %v630_v40 = vadd.f32 %v629_v61, %v628_v60  ;;  %v631_v53 = vsel %vm272_vm0, %v506_v28, 0.0  ;;  %v502_v63 = vmul.f32 %v2239_v10, %v2239_v10 }
 0x106   :  { %2919 = vst [vmem:[#allocation45_spill] sm:$0xff] %v2248_v37  ;;  %v623_v8 = vadd.f32 %v501_v41, %v500_v46  ;;  %v633_v6 = vsel %vm272_vm0, %v507_v33, 0.0  ;;  %v503_v11 = vmul.f32 %v2248_v37, %v2248_v37  ;;  %v815_v61 = vlaneseq  ;;  %v2920_v37 = vld [vmem:[#allocation61_spill] sm:$0xff] }
 0x107   :  { %616 = vadd.xlane.f32.xlu0 %v615_v24  ;;  %v632_v36 = vadd.f32 %v631_v53, %v630_v40 }
 0x108   :  { %v624_v13 = vadd.f32 %v623_v8, %v502_v63  ;;  %v816_v33 = vshrl.u32 %v815_v61, 7 }
 0x109   :  { %v634_v9 = vadd.f32 %v633_v6, %v632_v36 }
 0x10a   :  { %v625_v47 = vadd.f32 %v624_v13, %v503_v11  ;;  %v817_v63 = vsub.s32 0, %v816_v33  ;;  %v821_v8 = vsub.s32 1, %v816_v33  ;;  %v825_v11 = vsub.s32 2, %v816_v33 }
 0x10b   :  { %635 = vadd.xlane.f32.xlu1 %v634_v9  ;;  %v712_v9 = vld [vmem:[#allocation5] sm:$0xf]  ;;  %v829_v13 = vsub.s32 3, %v816_v33 }
 0x10c   :  { %626 = vadd.xlane.f32.xlu0 %v625_v47 }
 0x14c   :  { %v517_v44 = vpop.xlane.xlu0 %516 }
 0x14d   :  { %v512_v43 = vpop.xlane.xlu1 %511  ;;  %v638_v29 = vmul.f32 0.001953125, %v517_v44  ;;  %v713_v44 = vld [vmem:[#allocation7] sm:$0xf] }
 0x14e   :  { %v637_v28 = vmul.f32 0.001953125, %v512_v43  ;;  %v2270_v33 = vrot.slane %v713_v44, %v825_v11 }
 0x14f   :  { %v663_v60 = vadd.f32 1e-05, %v638_v29  ;;  %v2258_v29 = vrot.slane %v712_v9, %v817_v63 }
 0x150   :  { %v662_v24 = vadd.f32 1e-05, %v637_v28  ;;  %v2260_v28 = vrot.slane %v712_v9, %v821_v8 }
 0x151   :  { %1180 = vrsqrt.f32 %v663_v60 }
 0x152   :  { %1182 = vrsqrt.f32 %v662_v24  ;;  %v522_v46 = vpop.xlane.xlu1 %521  ;;  %v2262_v24 = vrot.slane %v712_v9, %v825_v11 }
 0x153   :  { %v639_v40 = vmul.f32 0.001953125, %v522_v46  ;;  %v2264_v46 = vrot.slane %v712_v9, %v829_v13  ;;  %v2923_v9 = vld [vmem:[#allocation64_spill] sm:$0xff] }
 0x155   :  { %v664_v41 = vadd.f32 1e-05, %v639_v40  ;;  %v527_v53 = vpop.xlane.xlu0 %526  ;;  %v2266_v40 = vrot.slane %v713_v44, %v817_v63  ;;  %v2924_v63 = vld [vmem:[#allocation65_spill] sm:$0xff] }
 0x156   :  { %v640_v36 = vmul.f32 0.001953125, %v527_v53 }
 0x157   :  { %1184 = vrsqrt.f32 %v664_v41  ;;  %v2268_v41 = vrot.slane %v713_v44, %v821_v8  ;;  %v2925_v8 = vld [vmem:[#allocation66_spill] sm:$0xff] }
 0x158   :  { %v665_v6 = vadd.f32 1e-05, %v640_v36  ;;  %v2272_v36 = vrot.slane %v713_v44, %v829_v13 }
 0x159   :  { %v532_v47 = vpop.xlane.xlu1 %531 }
 0x15a   :  { %1186 = vrsqrt.f32 %v665_v6  ;;  %v641_v43 = vmul.f32 0.001953125, %v532_v47 }
 0x15c   :  { %v666_v60 = vadd.f32 1e-05, %v641_v43  ;;  %v537_v61 = vpop.xlane.xlu0 %536  ;;  %v2921_v43 = vld [vmem:[#allocation62_spill] sm:$0xff] }
 0x15d   :  { %v642_v6 = vmul.f32 0.001953125, %v537_v61 }
 0x15e   :  { %v1181_v53 = vpop.eup %1180  ;;  %1188 = vrsqrt.f32 %v666_v60 }
 0x15f   :  { %v1183_v47 = vpop.eup %1182  ;;  %v718_v10 = vmul.f32 %v1181_v53, %v2920_v37  ;;  %v719_v17 = vmul.f32 %v1181_v53, %v2921_v43  ;;  %v720_v30 = vmul.f32 %v1181_v53, %v2922_v4  ;;  %v721_v59 = vmul.f32 %v1181_v53, %v2923_v9 }
 0x160   :  { %v714_v5 = vmul.f32 %v1183_v47, %v2924_v63  ;;  %v715_v26 = vmul.f32 %v1183_v47, %v2925_v8  ;;  %v716_v11 = vmul.f32 %v1183_v47, %v2926_v3  ;;  %v717_v13 = vmul.f32 %v1183_v47, %v2927_v55 }
 0x161   :  { %v542_v44 = vpop.xlane.xlu1 %541  ;;  %v839_v60 = vmul.f32 %v2258_v29, %v718_v10  ;;  %v840_v61 = vmul.f32 %v2260_v28, %v719_v17  ;;  %v841_v37 = vmul.f32 %v2262_v24, %v720_v30  ;;  %v842_v43 = vmul.f32 %v2264_v46, %v721_v59 }
 0x162   :  { %v835_v4 = vmul.f32 %v2258_v29, %v714_v5  ;;  %v836_v53 = vmul.f32 %v2260_v28, %v715_v26  ;;  %v837_v9 = vmul.f32 %v2262_v24, %v716_v11  ;;  %v838_v63 = vmul.f32 %v2264_v46, %v717_v13 }
 0x163   :  { %v960_v3 = vadd.f32 %v2266_v40, %v839_v60  ;;  %v961_v55 = vadd.f32 %v2268_v41, %v840_v61  ;;  %v962_v10 = vadd.f32 %v2270_v33, %v841_v37  ;;  %v963_v17 = vadd.f32 %v2272_v36, %v842_v43 }
 0x164   :  { %v1185_v47 = vpop.eup %1184  ;;  %v956_v30 = vadd.f32 %v2266_v40, %v835_v4  ;;  %v957_v59 = vadd.f32 %v2268_v41, %v836_v53  ;;  %v958_v5 = vadd.f32 %v2270_v33, %v837_v9  ;;  %v959_v26 = vadd.f32 %v2272_v36, %v838_v63 }
 0x165   :  { %v552_v8 = vpop.xlane.xlu1 %551  ;;  %1060 = vst [vmem:[#allocation8 + $0x20] sm:$0xff] %v960_v3  ;;  %1061 = vst [vmem:[#allocation8 + $0x28] sm:$0xff] %v961_v55  ;;  %v722_v11 = vmul.f32 %v1185_v47, %v1695_v54  ;;  %v723_v13 = vmul.f32 %v1185_v47, %v1698_v62  ;;  %v724_v60 = vmul.f32 %v1185_v47, %v1711_v12  ;;  %v667_v37 = vadd.f32 1e-05, %v642_v6 }
 0x166   :  { %1062 = vst [vmem:[#allocation8 + $0x30] sm:$0xff] %v962_v10  ;;  %1063 = vst [vmem:[#allocation8 + $0x38] sm:$0xff] %v963_v17  ;;  %v725_v61 = vmul.f32 %v1185_v47, %v1714_v2  ;;  %v643_v43 = vmul.f32 0.001953125, %v542_v44  ;;  %v645_v4 = vmul.f32 0.001953125, %v552_v8 }
 0x167   :  { %1056 = vst [vmem:[#allocation8] sm:$0xff] %v956_v30  ;;  %1057 = vst [vmem:[#allocation8 + $0x8] sm:$0xff] %v957_v59  ;;  %v1187_v53 = vpop.eup %1186  ;;  %v843_v9 = vmul.f32 %v2258_v29, %v722_v11  ;;  %v844_v63 = vmul.f32 %v2260_v28, %v723_v13  ;;  %v845_v54 = vmul.f32 %v2262_v24, %v724_v60  ;;  %1190 = vrsqrt.f32 %v667_v37 }
 0x168   :  { %1058 = vst [vmem:[#allocation8 + $0x10] sm:$0xff] %v958_v5  ;;  %1059 = vst [vmem:[#allocation8 + $0x18] sm:$0xff] %v959_v26  ;;  %v846_v62 = vmul.f32 %v2264_v46, %v725_v61  ;;  %v547_v3 = vpop.xlane.xlu0 %546  ;;  %v726_v12 = vmul.f32 %v1187_v53, %v1703_v57  ;;  %v727_v2 = vmul.f32 %v1187_v53, %v1706_v35 }
 0x169   :  { %v728_v55 = vmul.f32 %v1187_v53, %v1737_v19  ;;  %v729_v6 = vmul.f32 %v1187_v53, %v1742_v32  ;;  %v964_v44 = vadd.f32 %v2266_v40, %v843_v9  ;;  %v965_v10 = vadd.f32 %v2268_v41, %v844_v63  ;;  %v2928_v63 = vld [vmem:[#allocation73_spill] sm:$0xff] }
 0x16a   :  { %v966_v17 = vadd.f32 %v2270_v33, %v845_v54  ;;  %v967_v47 = vadd.f32 %v2272_v36, %v846_v62  ;;  %v847_v30 = vmul.f32 %v2258_v29, %v726_v12  ;;  %v848_v59 = vmul.f32 %v2260_v28, %v727_v2  ;;  %v2929_v62 = vld [vmem:[#allocation76_spill] sm:$0xff] }
 0x16b   :  { %v849_v57 = vmul.f32 %v2262_v24, %v728_v55  ;;  %v850_v35 = vmul.f32 %v2264_v46, %v729_v6  ;;  %v1189_v5 = vpop.eup %1188  ;;  %1064 = vst [vmem:[#allocation8 + $0x40] sm:$0xff] %v964_v44  ;;  %1065 = vst [vmem:[#allocation8 + $0x48] sm:$0xff] %v965_v10  ;;  %v668_v19 = vadd.f32 1e-05, %v643_v43  ;;  %v670_v32 = vadd.f32 1e-05, %v645_v4 }
 0x16c   :  { %1066 = vst [vmem:[#allocation8 + $0x50] sm:$0xff] %v966_v17  ;;  %1067 = vst [vmem:[#allocation8 + $0x58] sm:$0xff] %v967_v47  ;;  %v644_v26 = vmul.f32 0.001953125, %v547_v3  ;;  %v562_v8 = vpop.xlane.xlu1 %561  ;;  %v968_v11 = vadd.f32 %v2266_v40, %v847_v30  ;;  %v969_v13 = vadd.f32 %v2268_v41, %v848_v59  ;;  %v730_v53 = vmul.f32 %v1189_v5, %v1721_v0 }
 0x16d   :  { %v970_v60 = vadd.f32 %v2270_v33, %v849_v57  ;;  %v971_v61 = vadd.f32 %v2272_v36, %v850_v35  ;;  %v731_v9 = vmul.f32 %v1189_v5, %v1724_v21  ;;  %v732_v54 = vmul.f32 %v1189_v5, %v2928_v63 }
 0x16e   :  { %v733_v37 = vmul.f32 %v1189_v5, %v2929_v62  ;;  %1068 = vst [vmem:[#allocation8 + $0x60] sm:$0xff] %v968_v11  ;;  %1069 = vst [vmem:[#allocation8 + $0x68] sm:$0xff] %v969_v13  ;;  %1192 = vrsqrt.f32 %v668_v19  ;;  %v669_v4 = vadd.f32 1e-05, %v644_v26  ;;  %v647_v3 = vmul.f32 0.001953125, %v562_v8  ;;  %v2930_v13 = vld [vmem:[#allocation69_spill] sm:$0xff] }
 0x16f   :  { %v557_v43 = vpop.xlane.xlu0 %556  ;;  %1070 = vst [vmem:[#allocation8 + $0x70] sm:$0xff] %v970_v60  ;;  %1071 = vst [vmem:[#allocation8 + $0x78] sm:$0xff] %v971_v61  ;;  %v851_v2 = vmul.f32 %v2258_v29, %v730_v53  ;;  %v852_v55 = vmul.f32 %v2260_v28, %v731_v9  ;;  %v853_v0 = vmul.f32 %v2262_v24, %v732_v54  ;;  %1194 = vrsqrt.f32 %v670_v32  ;;  %v2931_v61 = vld [vmem:[#allocation70_spill] sm:$0xff]  ;;  %v2932_v9 = vld [vmem:[#allocation79_spill] sm:$0xff] }
 0x170   :  { %v646_v12 = vmul.f32 0.001953125, %v557_v43  ;;  %v854_v21 = vmul.f32 %v2264_v46, %v733_v37  ;;  %v672_v6 = vadd.f32 1e-05, %v647_v3  ;;  %1196 = vrsqrt.f32 %v669_v4  ;;  %v2933_v54 = vld [vmem:[#allocation81_spill] sm:$0xff] }
 0x171   :  { %v972_v44 = vadd.f32 %v2266_v40, %v851_v2  ;;  %v973_v10 = vadd.f32 %v2268_v41, %v852_v55  ;;  %v974_v17 = vadd.f32 %v2270_v33, %v853_v0 }
 0x172   :  { %v975_v47 = vadd.f32 %v2272_v36, %v854_v21  ;;  %v572_v30 = vpop.xlane.xlu1 %571  ;;  %v671_v57 = vadd.f32 1e-05, %v646_v12  ;;  %1198 = vrsqrt.f32 %v672_v6  ;;  %v2934_v21 = vld [vmem:[#allocation71_spill] sm:$0xff] }
 0x173   :  { %v649_v59 = vmul.f32 0.001953125, %v572_v30  ;;  %1072 = vst [vmem:[#allocation8 + $0x80] sm:$0xff] %v972_v44  ;;  %1073 = vst [vmem:[#allocation8 + $0x88] sm:$0xff] %v973_v10  ;;  %v2935_v44 = vld [vmem:[#allocation72_spill] sm:$0xff]  ;;  %v2937_v30 = vld [vmem:[#allocation87_spill] sm:$0xff] }
 0x174   :  { %1074 = vst [vmem:[#allocation8 + $0x90] sm:$0xff] %v974_v17  ;;  %1075 = vst [vmem:[#allocation8 + $0x98] sm:$0xff] %v975_v47  ;;  %1200 = vrsqrt.f32 %v671_v57  ;;  %v1191_v8 = vpop.eup %1190  ;;  %v2936_v17 = vld [vmem:[#allocation83_spill] sm:$0xff] }
 0x175   :  { %v567_v35 = vpop.xlane.xlu0 %566  ;;  %v674_v5 = vadd.f32 1e-05, %v649_v59  ;;  %v734_v60 = vmul.f32 %v1191_v8, %v2930_v13  ;;  %v735_v53 = vmul.f32 %v1191_v8, %v2931_v61  ;;  %v736_v63 = vmul.f32 %v1191_v8, %v2932_v9 }
 0x176   :  { %v648_v19 = vmul.f32 0.001953125, %v567_v35  ;;  %v737_v62 = vmul.f32 %v1191_v8, %v2933_v54 }
 0x177   :  { %1202 = vrsqrt.f32 %v674_v5  ;;  %v855_v12 = vmul.f32 %v2258_v29, %v734_v60  ;;  %v856_v2 = vmul.f32 %v2260_v28, %v735_v53  ;;  %v857_v55 = vmul.f32 %v2262_v24, %v736_v63  ;;  %v2938_v53 = vld [vmem:[#allocation77_spill] sm:$0xff]  ;;  %v2939_v63 = vld [vmem:[#allocation78_spill] sm:$0xff] }
 0x178   :  { %v673_v32 = vadd.f32 1e-05, %v648_v19  ;;  %v858_v0 = vmul.f32 %v2264_v46, %v737_v62  ;;  %v2940_v62 = vld [vmem:[#allocation89_spill] sm:$0xff] }
 0x179   :  { %v582_v26 = vpop.xlane.xlu1 %581  ;;  %v976_v35 = vadd.f32 %v2266_v40, %v855_v12  ;;  %v977_v5 = vadd.f32 %v2268_v41, %v856_v2  ;;  %v978_v19 = vadd.f32 %v2270_v33, %v857_v55 }
 0x17a   :  { %v651_v11 = vmul.f32 0.001953125, %v582_v26  ;;  %1204 = vrsqrt.f32 %v673_v32  ;;  %v979_v32 = vadd.f32 %v2272_v36, %v858_v0 }
 0x17b   :  { %v577_v37 = vpop.xlane.xlu0 %576  ;;  %v1193_v3 = vpop.eup %1192  ;;  %1076 = vst [vmem:[#allocation8 + $0xa0] sm:$0xff] %v976_v35  ;;  %1077 = vst [vmem:[#allocation8 + $0xa8] sm:$0xff] %v977_v5  ;;  %v2943_v35 = vld [vmem:[#allocation82_spill] sm:$0xff] }
 0x17c   :  { %v2338_v43 = vadd.f32 1e-05, %v651_v11  ;;  %v2340_v4 = vmul.f32 0.001953125, %v577_v37  ;;  %v738_v6 = vmul.f32 %v1193_v3, %v2934_v21  ;;  %v739_v10 = vmul.f32 %v1193_v3, %v2935_v44  ;;  %v1195_v57 = vpop.eup %1194  ;;  %1078 = vst [vmem:[#allocation8 + $0xb0] sm:$0xff] %v978_v19  ;;  %1079 = vst [vmem:[#allocation8 + $0xb8] sm:$0xff] %v979_v32  ;;  %v2944_v19 = vld [vmem:[#allocation14_spill] sm:$0xff] }
 0x17d   :  { %v740_v47 = vmul.f32 %v1193_v3, %v2936_v17  ;;  %v741_v59 = vmul.f32 %v1193_v3, %v2937_v30  ;;  %v1197_v61 = vpop.eup %1196  ;;  %v746_v9 = vmul.f32 %v1195_v57, %v2938_v53  ;;  %v747_v54 = vmul.f32 %v1195_v57, %v2939_v63  ;;  %v2941_v3 = vld [vmem:[#allocation15_spill] sm:$0xff] }
 0x17e   :  { %v859_v8 = vmul.f32 %v2258_v29, %v738_v6  ;;  %v860_v11 = vmul.f32 %v2260_v28, %v739_v10  ;;  %v748_v37 = vmul.f32 %v1195_v57, %v2940_v62  ;;  %v749_v12 = vmul.f32 %v1195_v57, %v2941_v3 }
 0x17f   :  { %v2354_v26 = vpop.xlane.xlu1 %591  ;;  %v861_v13 = vmul.f32 %v2262_v24, %v740_v47  ;;  %v862_v60 = vmul.f32 %v2264_v46, %v741_v59  ;;  %v867_v44 = vmul.f32 %v2258_v29, %v746_v9  ;;  %v868_v10 = vmul.f32 %v2260_v28, %v747_v54  ;;  %v1199_v30 = vpop.eup %1198  ;;  %v2942_v59 = vld [vmem:[#allocation80_spill] sm:$0xff] }
 0x180   :  { %v980_v55 = vadd.f32 %v2266_v40, %v859_v8  ;;  %v981_v0 = vadd.f32 %v2268_v41, %v860_v11  ;;  %v869_v17 = vmul.f32 %v2262_v24, %v748_v37  ;;  %v870_v47 = vmul.f32 %v2264_v46, %v749_v12  ;;  %v2945_v8 = vld [vmem:[#allocation17_spill] sm:$0xff] }
 0x181   :  { %v2364_v2 = vpop.xlane.xlu0 %586  ;;  %v982_v21 = vadd.f32 %v2270_v33, %v861_v13  ;;  %v983_v6 = vadd.f32 %v2272_v36, %v862_v60  ;;  %v742_v57 = vmul.f32 %v1197_v61, %v2942_v59  ;;  %v743_v5 = vmul.f32 %v1197_v61, %v2943_v35  ;;  %v1201_v54 = vpop.eup %1200 }
 0x182   :  { %1080 = vst [vmem:[#allocation8 + $0xc0] sm:$0xff] %v980_v55  ;;  %1081 = vst [vmem:[#allocation8 + $0xc8] sm:$0xff] %v981_v0  ;;  %v744_v32 = vmul.f32 %v1197_v61, %v2944_v19  ;;  %v745_v11 = vmul.f32 %v1197_v61, %v2945_v8  ;;  %v988_v60 = vadd.f32 %v2266_v40, %v867_v44  ;;  %v2946_v0 = vld [vmem:[#allocation84_spill] sm:$0xff]  ;;  %1206 = vrsqrt.f32 %v2338_v43 }
 0x183   :  { %1082 = vst [vmem:[#allocation8 + $0xd0] sm:$0xff] %v982_v21  ;;  %1083 = vst [vmem:[#allocation8 + $0xd8] sm:$0xff] %v983_v6  ;;  %v989_v53 = vadd.f32 %v2268_v41, %v868_v10  ;;  %v990_v9 = vadd.f32 %v2270_v33, %v869_v17  ;;  %v991_v63 = vadd.f32 %v2272_v36, %v870_v47  ;;  %v2947_v6 = vld [vmem:[#allocation85_spill] sm:$0xff]  ;;  %v2948_v10 = vld [vmem:[#allocation27_spill] sm:$0xff] }
 0x184   :  { %v2378_v13 = vpop.xlane.xlu1 %601  ;;  %v863_v62 = vmul.f32 %v2258_v29, %v742_v57  ;;  %v864_v37 = vmul.f32 %v2260_v28, %v743_v5  ;;  %v865_v3 = vmul.f32 %v2262_v24, %v744_v32  ;;  %v866_v12 = vmul.f32 %v2264_v46, %v745_v11  ;;  %v1203_v55 = vpop.eup %1202  ;;  %1088 = vst [vmem:[#allocation8 + $0x100] sm:$0xff] %v988_v60  ;;  %v2949_v47 = vld [vmem:[#allocation28_spill] sm:$0xff] }
 0x185   :  { %1089 = vst [vmem:[#allocation8 + $0x108] sm:$0xff] %v989_v53  ;;  %1090 = vst [vmem:[#allocation8 + $0x110] sm:$0xff] %v990_v9  ;;  %v754_v21 = vmul.f32 %v1199_v30, %v2946_v0  ;;  %v755_v44 = vmul.f32 %v1199_v30, %v2947_v6  ;;  %v756_v17 = vmul.f32 %v1199_v30, %v2948_v10  ;;  %v2953_v0 = vld [vmem:[#allocation33_spill] sm:$0xff] }
 0x186   :  { %v2388_v61 = vpop.xlane.xlu0 %596  ;;  %1091 = vst [vmem:[#allocation8 + $0x118] sm:$0xff] %v991_v63  ;;  %v757_v59 = vmul.f32 %v1199_v30, %v2949_v47  ;;  %v984_v57 = vadd.f32 %v2266_v40, %v863_v62  ;;  %v985_v35 = vadd.f32 %v2268_v41, %v864_v37  ;;  %v986_v5 = vadd.f32 %v2270_v33, %v865_v3  ;;  %v2950_v30 = vld [vmem:[#allocation86_spill] sm:$0xff]  ;;  %v2951_v62 = vld [vmem:[#allocation88_spill] sm:$0xff]  ;;  %v2952_v3 = vld [vmem:[#allocation21_spill] sm:$0xff] }
 0x187   :  { %v987_v19 = vadd.f32 %v2272_v36, %v866_v12  ;;  %v1205_v32 = vpop.eup %1204  ;;  %v875_v8 = vmul.f32 %v2258_v29, %v754_v21  ;;  %v876_v11 = vmul.f32 %v2260_v28, %v755_v44  ;;  %v877_v60 = vmul.f32 %v2262_v24, %v756_v17 }
 0x188   :  { %v878_v53 = vmul.f32 %v2264_v46, %v757_v59  ;;  %1084 = vst [vmem:[#allocation8 + $0xe0] sm:$0xff] %v984_v57  ;;  %1085 = vst [vmem:[#allocation8 + $0xe8] sm:$0xff] %v985_v35  ;;  %v750_v63 = vmul.f32 %v1201_v54, %v2950_v30  ;;  %v751_v37 = vmul.f32 %v1201_v54, %v2951_v62 }
 0x189   :  { %v2402_v9 = vpop.xlane.xlu1 %611  ;;  %1086 = vst [vmem:[#allocation8 + $0xf0] sm:$0xff] %v986_v5  ;;  %1087 = vst [vmem:[#allocation8 + $0xf8] sm:$0xff] %v987_v19  ;;  %v752_v12 = vmul.f32 %v1201_v54, %v2952_v3  ;;  %v753_v21 = vmul.f32 %v1201_v54, %v2953_v0  ;;  %v996_v6 = vadd.f32 %v2266_v40, %v875_v8  ;;  %v2954_v54 = vld [vmem:[#allocation90_spill] sm:$0xff]  ;;  %v2955_v8 = vld [vmem:[#allocation91_spill] sm:$0xff] }
 0x18a   :  { %v997_v44 = vadd.f32 %v2268_v41, %v876_v11  ;;  %v998_v10 = vadd.f32 %v2270_v33, %v877_v60  ;;  %v999_v17 = vadd.f32 %v2272_v36, %v878_v53  ;;  %v871_v59 = vmul.f32 %v2258_v29, %v750_v63  ;;  %v2956_v60 = vld [vmem:[#allocation35_spill] sm:$0xff] }
 0x18b   :  { %v607_v47 = vpop.xlane.xlu0 %606  ;;  %v872_v57 = vmul.f32 %v2260_v28, %v751_v37  ;;  %v873_v35 = vmul.f32 %v2262_v24, %v752_v12  ;;  %v874_v5 = vmul.f32 %v2264_v46, %v753_v21  ;;  %1096 = vst [vmem:[#allocation8 + $0x140] sm:$0xff] %v996_v6  ;;  %v762_v19 = vmul.f32 %v1203_v55, %v2954_v54 }
 0x18c   :  { %1097 = vst [vmem:[#allocation8 + $0x148] sm:$0xff] %v997_v44  ;;  %1098 = vst [vmem:[#allocation8 + $0x150] sm:$0xff] %v998_v10  ;;  %v763_v11 = vmul.f32 %v1203_v55, %v2955_v8  ;;  %v764_v30 = vmul.f32 %v1203_v55, %v2956_v60  ;;  %v765_v53 = vmul.f32 %v1203_v55, %v1982_v22  ;;  %v2957_v22 = vld [vmem:[#allocation19_spill] sm:$0xff]  ;;  %v2958_v10 = vld [vmem:[#allocation20_spill] sm:$0xff] }
 0x18d   :  { %1099 = vst [vmem:[#allocation8 + $0x158] sm:$0xff] %v999_v17  ;;  %v992_v63 = vadd.f32 %v2266_v40, %v871_v59  ;;  %v993_v62 = vadd.f32 %v2268_v41, %v872_v57  ;;  %v994_v37 = vadd.f32 %v2270_v33, %v873_v35  ;;  %v995_v3 = vadd.f32 %v2272_v36, %v874_v5  ;;  %v2959_v59 = vld [vmem:[#allocation22_spill] sm:$0xff]  ;;  %v2960_v35 = vld [vmem:[#allocation23_spill] sm:$0xff] }
 0x18e   :  { %v883_v12 = vmul.f32 %v2258_v29, %v762_v19  ;;  %v884_v0 = vmul.f32 %v2260_v28, %v763_v11  ;;  %v885_v21 = vmul.f32 %v2262_v24, %v764_v30  ;;  %v886_v6 = vmul.f32 %v2264_v46, %v765_v53  ;;  %v622_v44 = vpop.xlane.xlu1 %621 }
 0x18f   :  { %1092 = vst [vmem:[#allocation8 + $0x120] sm:$0xff] %v992_v63  ;;  %1093 = vst [vmem:[#allocation8 + $0x128] sm:$0xff] %v993_v62  ;;  %v758_v55 = vmul.f32 %v1205_v32, %v2957_v22  ;;  %v759_v17 = vmul.f32 %v1205_v32, %v2958_v10  ;;  %v760_v57 = vmul.f32 %v1205_v32, %v2959_v59  ;;  %v655_v10 = vmul.f32 0.001953125, %v2378_v13 }
 0x190   :  { %1094 = vst [vmem:[#allocation8 + $0x130] sm:$0xff] %v994_v37  ;;  %1095 = vst [vmem:[#allocation8 + $0x138] sm:$0xff] %v995_v3  ;;  %v761_v5 = vmul.f32 %v1205_v32, %v2960_v35  ;;  %v1004_v54 = vadd.f32 %v2266_v40, %v883_v12  ;;  %v1005_v19 = vadd.f32 %v2268_v41, %v884_v0  ;;  %v617_v60 = vpop.xlane.xlu0 %616  ;;  %v675_v32 = vadd.f32 1e-05, %v2340_v4 }
 0x191   :  { %v1006_v8 = vadd.f32 %v2270_v33, %v885_v21  ;;  %v1007_v11 = vadd.f32 %v2272_v36, %v886_v6  ;;  %v879_v30 = vmul.f32 %v2258_v29, %v758_v55  ;;  %v880_v53 = vmul.f32 %v2260_v28, %v759_v17 }
 0x192   :  { %v881_v63 = vmul.f32 %v2262_v24, %v760_v57  ;;  %v882_v62 = vmul.f32 %v2264_v46, %v761_v5  ;;  %1104 = vst [vmem:[#allocation8 + $0x180] sm:$0xff] %v1004_v54  ;;  %1105 = vst [vmem:[#allocation8 + $0x188] sm:$0xff] %v1005_v19  ;;  %v653_v37 = vmul.f32 0.001953125, %v2354_v26  ;;  %v652_v3 = vmul.f32 0.001953125, %v2364_v2 }
 0x193   :  { %1106 = vst [vmem:[#allocation8 + $0x190] sm:$0xff] %v1006_v8  ;;  %1107 = vst [vmem:[#allocation8 + $0x198] sm:$0xff] %v1007_v11  ;;  %v1000_v12 = vadd.f32 %v2266_v40, %v879_v30  ;;  %v1001_v0 = vadd.f32 %v2268_v41, %v880_v53  ;;  %1208 = vrsqrt.f32 %v675_v32  ;;  %v654_v4 = vmul.f32 0.001953125, %v2388_v61  ;;  %v2962_v53 = vld [vmem:[#allocation25_spill] sm:$0xff] }
 0x194   :  { %v1002_v21 = vadd.f32 %v2270_v33, %v881_v63  ;;  %v1003_v6 = vadd.f32 %v2272_v36, %v882_v62  ;;  %v678_v22 = vadd.f32 1e-05, %v653_v37  ;;  %v677_v55 = vadd.f32 1e-05, %v652_v3  ;;  %v636_v43 = vpop.xlane.xlu1 %635  ;;  %v2963_v62 = vld [vmem:[#allocation40_spill] sm:$0xff] }
 0x195   :  { %1100 = vst [vmem:[#allocation8 + $0x160] sm:$0xff] %v1000_v12  ;;  %1101 = vst [vmem:[#allocation8 + $0x168] sm:$0xff] %v1001_v0  ;;  %v657_v26 = vmul.f32 0.001953125, %v2402_v9  ;;  %v656_v2 = vmul.f32 0.001953125, %v607_v47  ;;  %v659_v17 = vmul.f32 0.001953125, %v622_v44  ;;  %v658_v57 = vmul.f32 0.001953125, %v617_v60  ;;  %v627_v35 = vpop.xlane.xlu0 %626  ;;  %v1207_v47 = vpop.eup %1206 }
 0x196   :  { %1102 = vst [vmem:[#allocation8 + $0x170] sm:$0xff] %v1002_v21  ;;  %1103 = vst [vmem:[#allocation8 + $0x178] sm:$0xff] %v1003_v6  ;;  %1210 = vrsqrt.f32 %v678_v22  ;;  %v680_v59 = vadd.f32 1e-05, %v655_v10  ;;  %v679_v5 = vadd.f32 1e-05, %v654_v4  ;;  %v771_v63 = vmul.f32 %v1207_v47, %v2962_v53 }
 0x197   :  { %v682_v54 = vadd.f32 1e-05, %v657_v26  ;;  %v661_v19 = vmul.f32 0.001953125, %v636_v43  ;;  %1212 = vrsqrt.f32 %v677_v55  ;;  %v681_v13 = vadd.f32 1e-05, %v656_v2  ;;  %v2961_v44 = vld [vmem:[#allocation24_spill] sm:$0xff] }
 0x198   :  { %1214 = vrsqrt.f32 %v680_v59  ;;  %v684_v8 = vadd.f32 1e-05, %v659_v17  ;;  %v660_v11 = vmul.f32 0.001953125, %v627_v35  ;;  %v683_v30 = vadd.f32 1e-05, %v658_v57  ;;  %v2964_v43 = vld [vmem:[#allocation29_spill] sm:$0xff] }
 0x199   :  { %1216 = vrsqrt.f32 %v679_v5  ;;  %v686_v61 = vadd.f32 1e-05, %v661_v19  ;;  %v770_v60 = vmul.f32 %v1207_v47, %v2961_v44  ;;  %v772_v32 = vmul.f32 %v1207_v47, %v2963_v62  ;;  %v2965_v26 = vld [vmem:[#allocation44_spill] sm:$0xff] }
 0x19a   :  { %1218 = vrsqrt.f32 %v682_v54  ;;  %v685_v9 = vadd.f32 1e-05, %v660_v11  ;;  %v773_v37 = vmul.f32 %v1207_v47, %v2034_v23  ;;  %v892_v0 = vmul.f32 %v2260_v28, %v771_v63 }
 0x19b   :  { %1220 = vrsqrt.f32 %v681_v13  ;;  %v891_v12 = vmul.f32 %v2258_v29, %v770_v60  ;;  %v893_v21 = vmul.f32 %v2262_v24, %v772_v32 }
 0x19c   :  { %1222 = vrsqrt.f32 %v684_v8  ;;  %v894_v6 = vmul.f32 %v2264_v46, %v773_v37  ;;  %v1013_v17 = vadd.f32 %v2268_v41, %v892_v0  ;;  %v2966_v8 = vld [vmem:[#allocation16_spill] sm:$0xff] }
 0x19d   :  { %1224 = vrsqrt.f32 %v683_v30  ;;  %v1012_v23 = vadd.f32 %v2266_v40, %v891_v12  ;;  %v1014_v59 = vadd.f32 %v2270_v33, %v893_v21  ;;  %v2967_v30 = vld [vmem:[#allocation26_spill] sm:$0xff]  ;;  %v2968_v0 = vld [vmem:[#allocation32_spill] sm:$0xff] }
 0x19e   :  { %1226 = vrsqrt.f32 %v686_v61  ;;  %v1015_v57 = vadd.f32 %v2272_v36, %v894_v6  ;;  %1113 = vst [vmem:[#allocation8 + $0x1c8] sm:$0xff] %v1013_v17 }
 0x19f   :  { %1228 = vrsqrt.f32 %v685_v9  ;;  %1112 = vst [vmem:[#allocation8 + $0x1c0] sm:$0xff] %v1012_v23  ;;  %1114 = vst [vmem:[#allocation8 + $0x1d0] sm:$0xff] %v1014_v59  ;;  %v2969_v59 = vld [vmem:[#allocation36_spill] sm:$0xff] }
 0x1a0   :  { %v1209_v3 = vpop.eup %1208  ;;  %1115 = vst [vmem:[#allocation8 + $0x1d8] sm:$0xff] %v1015_v57 }
 0x1a1   :  { %v766_v55 = vmul.f32 %v1209_v3, %v1894_v58  ;;  %v767_v10 = vmul.f32 %v1209_v3, %v1902_v51  ;;  %v768_v4 = vmul.f32 %v1209_v3, %v2964_v43  ;;  %v769_v2 = vmul.f32 %v1209_v3, %v2965_v26 }
 0x1a3   :  { %v1211_v22 = vpop.eup %1210  ;;  %v887_v5 = vmul.f32 %v2258_v29, %v766_v55  ;;  %v888_v54 = vmul.f32 %v2260_v28, %v767_v10  ;;  %v889_v58 = vmul.f32 %v2262_v24, %v768_v4  ;;  %v890_v51 = vmul.f32 %v2264_v46, %v769_v2 }
 0x1a4   :  { %v1213_v35 = vpop.eup %1212  ;;  %v778_v13 = vmul.f32 %v1211_v22, %v1918_v49  ;;  %v779_v11 = vmul.f32 %v1211_v22, %v2966_v8  ;;  %v780_v61 = vmul.f32 %v1211_v22, %v2967_v30  ;;  %v781_v9 = vmul.f32 %v1211_v22, %v2086_v16 }
 0x1a5   :  { %v1215_v19 = vpop.eup %1214  ;;  %v1008_v44 = vadd.f32 %v2266_v40, %v887_v5  ;;  %v1009_v60 = vadd.f32 %v2268_v41, %v888_v54  ;;  %v1010_v53 = vadd.f32 %v2270_v33, %v889_v58  ;;  %v1011_v63 = vadd.f32 %v2272_v36, %v890_v51 }
 0x1a6   :  { %v1217_v47 = vpop.eup %1216  ;;  %v899_v32 = vmul.f32 %v2258_v29, %v778_v13  ;;  %v900_v49 = vmul.f32 %v2260_v28, %v779_v11  ;;  %v901_v37 = vmul.f32 %v2262_v24, %v780_v61  ;;  %v902_v3 = vmul.f32 %v2264_v46, %v781_v9 }
 0x1a7   :  { %v2479_v62 = vpop.eup %1218  ;;  %1108 = vst [vmem:[#allocation8 + $0x1a0] sm:$0xff] %v1008_v44  ;;  %1109 = vst [vmem:[#allocation8 + $0x1a8] sm:$0xff] %v1009_v60  ;;  %v774_v12 = vmul.f32 %v1213_v35, %v1932_v7  ;;  %v775_v21 = vmul.f32 %v1213_v35, %v2968_v0  ;;  %v776_v6 = vmul.f32 %v1213_v35, %v2100_v42 }
 0x1a8   :  { %v2485_v16 = vpop.eup %1220  ;;  %1110 = vst [vmem:[#allocation8 + $0x1b0] sm:$0xff] %v1010_v53  ;;  %1111 = vst [vmem:[#allocation8 + $0x1b8] sm:$0xff] %v1011_v63  ;;  %v777_v22 = vmul.f32 %v1213_v35, %v2104_v38  ;;  %v1020_v10 = vadd.f32 %v2266_v40, %v899_v32  ;;  %v1021_v43 = vadd.f32 %v2268_v41, %v900_v49  ;;  %v2970_v35 = vld [vmem:[#allocation18_spill] sm:$0xff] }
 0x1a9   :  { %v2491_v55 = vpop.eup %1222  ;;  %v1022_v4 = vadd.f32 %v2270_v33, %v901_v37  ;;  %v1023_v26 = vadd.f32 %v2272_v36, %v902_v3  ;;  %v895_v7 = vmul.f32 %v2258_v29, %v774_v12  ;;  %v896_v23 = vmul.f32 %v2260_v28, %v775_v21  ;;  %v2973_v21 = vld [vmem:[#allocation50_spill] sm:$0xff] }
 0x1aa   :  { %v2497_v2 = vpop.eup %1224  ;;  %v897_v42 = vmul.f32 %v2262_v24, %v776_v6  ;;  %v898_v38 = vmul.f32 %v2264_v46, %v777_v22  ;;  %1120 = vst [vmem:[#allocation8 + $0x200] sm:$0xff] %v1020_v10  ;;  %1121 = vst [vmem:[#allocation8 + $0x208] sm:$0xff] %v1021_v43  ;;  %v786_v57 = vmul.f32 %v1215_v19, %v2969_v59 }
 0x1ab   :  { %v2503_v17 = vpop.eup %1226  ;;  %1122 = vst [vmem:[#allocation8 + $0x210] sm:$0xff] %v1022_v4  ;;  %1123 = vst [vmem:[#allocation8 + $0x218] sm:$0xff] %v1023_v26  ;;  %v787_v5 = vmul.f32 %v1215_v19, %v2970_v35  ;;  %v788_v54 = vmul.f32 %v1215_v19, %v2118_v27  ;;  %v789_v58 = vmul.f32 %v1215_v19, %v2122_v39 }
 0x1ac   :  { %v1016_v51 = vadd.f32 %v2266_v40, %v895_v7  ;;  %v1017_v13 = vadd.f32 %v2268_v41, %v896_v23  ;;  %v1018_v8 = vadd.f32 %v2270_v33, %v897_v42  ;;  %v1019_v11 = vadd.f32 %v2272_v36, %v898_v38  ;;  %v2513_v30 = vpop.eup %1228 }
 0x1ad   :  { %v907_v61 = vmul.f32 %v2258_v29, %v786_v57  ;;  %v908_v9 = vmul.f32 %v2260_v28, %v787_v5  ;;  %v909_v44 = vmul.f32 %v2262_v24, %v788_v54  ;;  %v910_v27 = vmul.f32 %v2264_v46, %v789_v58 }
 0x1ae   :  { %1116 = vst [vmem:[#allocation8 + $0x1e0] sm:$0xff] %v1016_v51  ;;  %1117 = vst [vmem:[#allocation8 + $0x1e8] sm:$0xff] %v1017_v13  ;;  %v782_v39 = vmul.f32 %v1217_v47, %v1978_v20  ;;  %v783_v19 = vmul.f32 %v1217_v47, %v1990_v56  ;;  %v784_v60 = vmul.f32 %v1217_v47, %v2142_v50 }
 0x1af   :  { %1118 = vst [vmem:[#allocation8 + $0x1f0] sm:$0xff] %v1018_v8  ;;  %1119 = vst [vmem:[#allocation8 + $0x1f8] sm:$0xff] %v1019_v11  ;;  %v785_v53 = vmul.f32 %v1217_v47, %v2146_v25  ;;  %v1028_v63 = vadd.f32 %v2266_v40, %v907_v61  ;;  %v1029_v32 = vadd.f32 %v2268_v41, %v908_v9  ;;  %v2971_v25 = vld [vmem:[#allocation41_spill] sm:$0xff]  ;;  %v2972_v47 = vld [vmem:[#allocation43_spill] sm:$0xff] }
 0x1b0   :  { %v1030_v49 = vadd.f32 %v2270_v33, %v909_v44  ;;  %v1031_v37 = vadd.f32 %v2272_v36, %v910_v27  ;;  %v903_v3 = vmul.f32 %v2258_v29, %v782_v39  ;;  %v904_v12 = vmul.f32 %v2260_v28, %v783_v19 }
 0x1b1   :  { %v905_v20 = vmul.f32 %v2262_v24, %v784_v60  ;;  %v906_v56 = vmul.f32 %v2264_v46, %v785_v53  ;;  %1128 = vst [vmem:[#allocation8 + $0x240] sm:$0xff] %v1028_v63  ;;  %1129 = vst [vmem:[#allocation8 + $0x248] sm:$0xff] %v1029_v32  ;;  %v794_v50 = vmul.f32 %v2479_v62, %v2971_v25  ;;  %v2976_v53 = vld [vmem:[#allocation51_spill] sm:$0xff]  ;;  %v2977_v32 = vld [vmem:[#allocation34_spill] sm:$0xff] }
 0x1b2   :  { %1130 = vst [vmem:[#allocation8 + $0x250] sm:$0xff] %v1030_v49  ;;  %1131 = vst [vmem:[#allocation8 + $0x258] sm:$0xff] %v1031_v37  ;;  %v795_v0 = vmul.f32 %v2479_v62, %v2972_v47  ;;  %v796_v6 = vmul.f32 %v2479_v62, %v2973_v21  ;;  %v797_v22 = vmul.f32 %v2479_v62, %v2160_v52 }
 0x1b3   :  { %v1024_v10 = vadd.f32 %v2266_v40, %v903_v3  ;;  %v1025_v43 = vadd.f32 %v2268_v41, %v904_v12  ;;  %v1026_v4 = vadd.f32 %v2270_v33, %v905_v20  ;;  %v1027_v26 = vadd.f32 %v2272_v36, %v906_v56 }
 0x1b4   :  { %v915_v7 = vmul.f32 %v2258_v29, %v794_v50  ;;  %v916_v23 = vmul.f32 %v2260_v28, %v795_v0  ;;  %v917_v42 = vmul.f32 %v2262_v24, %v796_v6  ;;  %v918_v38 = vmul.f32 %v2264_v46, %v797_v22  ;;  %v2979_v0 = vld [vmem:[#allocation75_spill] sm:$0xff]  ;;  %v2980_v6 = vld [vmem:[#allocation38_spill] sm:$0xff] }
 0x1b5   :  { %1124 = vst [vmem:[#allocation8 + $0x220] sm:$0xff] %v1024_v10  ;;  %1125 = vst [vmem:[#allocation8 + $0x228] sm:$0xff] %v1025_v43  ;;  %v790_v52 = vmul.f32 %v2485_v16, %v2030_v45  ;;  %v791_v62 = vmul.f32 %v2485_v16, %v2042_v18  ;;  %v792_v59 = vmul.f32 %v2485_v16, %v2174_v1  ;;  %v2981_v10 = vld [vmem:[#allocation39_spill] sm:$0xff] }
 0x1b6   :  { %1126 = vst [vmem:[#allocation8 + $0x230] sm:$0xff] %v1026_v4  ;;  %1127 = vst [vmem:[#allocation8 + $0x238] sm:$0xff] %v1027_v26  ;;  %v793_v57 = vmul.f32 %v2485_v16, %v2178_v34  ;;  %v1036_v35 = vadd.f32 %v2266_v40, %v915_v7  ;;  %v1037_v5 = vadd.f32 %v2268_v41, %v916_v23  ;;  %v2974_v16 = vld [vmem:[#allocation37_spill] sm:$0xff] }
 0x1b7   :  { %v1038_v54 = vadd.f32 %v2270_v33, %v917_v42  ;;  %v1039_v58 = vadd.f32 %v2272_v36, %v918_v38  ;;  %v911_v51 = vmul.f32 %v2258_v29, %v790_v52  ;;  %v912_v45 = vmul.f32 %v2260_v28, %v791_v62 }
 0x1b8   :  { %v913_v18 = vmul.f32 %v2262_v24, %v792_v59  ;;  %v914_v13 = vmul.f32 %v2264_v46, %v793_v57  ;;  %1136 = vst [vmem:[#allocation8 + $0x280] sm:$0xff] %v1036_v35  ;;  %1137 = vst [vmem:[#allocation8 + $0x288] sm:$0xff] %v1037_v5  ;;  %v802_v1 = vmul.f32 %v2491_v55, %v2074_v15  ;;  %v2983_v57 = vld [vmem:[#allocation48_spill] sm:$0xff] }
 0x1b9   :  { %1138 = vst [vmem:[#allocation8 + $0x290] sm:$0xff] %v1038_v54  ;;  %1139 = vst [vmem:[#allocation8 + $0x298] sm:$0xff] %v1039_v58  ;;  %v803_v34 = vmul.f32 %v2491_v55, %v2078_v31  ;;  %v804_v8 = vmul.f32 %v2491_v55, %v2974_v16  ;;  %v805_v11 = vmul.f32 %v2491_v55, %v2194_v48  ;;  %v2975_v55 = vld [vmem:[#allocation30_spill] sm:$0xff]  ;;  %v2984_v5 = vld [vmem:[#allocation56_spill] sm:$0xff] }
 0x1ba   :  { %v1032_v61 = vadd.f32 %v2266_v40, %v911_v51  ;;  %v1033_v9 = vadd.f32 %v2268_v41, %v912_v45  ;;  %v1034_v44 = vadd.f32 %v2270_v33, %v913_v18  ;;  %v1035_v27 = vadd.f32 %v2272_v36, %v914_v13  ;;  %v2985_v58 = vld [vmem:[#allocation45_spill] sm:$0xff] }
 0x1bb   :  { %v923_v39 = vmul.f32 %v2258_v29, %v802_v1  ;;  %v924_v15 = vmul.f32 %v2260_v28, %v803_v34  ;;  %v925_v31 = vmul.f32 %v2262_v24, %v804_v8  ;;  %v926_v19 = vmul.f32 %v2264_v46, %v805_v11 }
 0x1bc   :  { %1132 = vst [vmem:[#allocation8 + $0x260] sm:$0xff] %v1032_v61  ;;  %1133 = vst [vmem:[#allocation8 + $0x268] sm:$0xff] %v1033_v9  ;;  %v798_v48 = vmul.f32 %v2497_v2, %v2082_v14  ;;  %v799_v60 = vmul.f32 %v2497_v2, %v2975_v55  ;;  %v800_v63 = vmul.f32 %v2497_v2, %v2976_v53 }
 0x1bd   :  { %1134 = vst [vmem:[#allocation8 + $0x270] sm:$0xff] %v1034_v44  ;;  %1135 = vst [vmem:[#allocation8 + $0x278] sm:$0xff] %v1035_v27  ;;  %v801_v49 = vmul.f32 %v2497_v2, %v2977_v32  ;;  %v1044_v37 = vadd.f32 %v2266_v40, %v923_v39  ;;  %v1045_v3 = vadd.f32 %v2268_v41, %v924_v15  ;;  %v2978_v2 = vld [vmem:[#allocation74_spill] sm:$0xff] }
 0x1be   :  { %v1046_v12 = vadd.f32 %v2270_v33, %v925_v31  ;;  %v1047_v20 = vadd.f32 %v2272_v36, %v926_v19  ;;  %v919_v56 = vmul.f32 %v2258_v29, %v798_v48  ;;  %v920_v14 = vmul.f32 %v2260_v28, %v799_v60 }
 0x1bf   :  { %v921_v25 = vmul.f32 %v2262_v24, %v800_v63  ;;  %v922_v50 = vmul.f32 %v2264_v46, %v801_v49  ;;  %1144 = vst [vmem:[#allocation8 + $0x2c0] sm:$0xff] %v1044_v37  ;;  %1145 = vst [vmem:[#allocation8 + $0x2c8] sm:$0xff] %v1045_v3  ;;  %v810_v47 = vmul.f32 %v2503_v17, %v2978_v2 }
 0x1c0   :  { %1146 = vst [vmem:[#allocation8 + $0x2d0] sm:$0xff] %v1046_v12  ;;  %1147 = vst [vmem:[#allocation8 + $0x2d8] sm:$0xff] %v1047_v20  ;;  %v811_v21 = vmul.f32 %v2503_v17, %v2979_v0  ;;  %v812_v22 = vmul.f32 %v2503_v17, %v2980_v6  ;;  %v813_v43 = vmul.f32 %v2503_v17, %v2981_v10  ;;  %v2982_v17 = vld [vmem:[#allocation31_spill] sm:$0xff] }
 0x1c1   :  { %v1040_v4 = vadd.f32 %v2266_v40, %v919_v56  ;;  %v1041_v26 = vadd.f32 %v2268_v41, %v920_v14  ;;  %v1042_v7 = vadd.f32 %v2270_v33, %v921_v25  ;;  %v1043_v23 = vadd.f32 %v2272_v36, %v922_v50 }
 0x1c2   :  { %v931_v42 = vmul.f32 %v2258_v29, %v810_v47  ;;  %v932_v38 = vmul.f32 %v2260_v28, %v811_v21  ;;  %v933_v52 = vmul.f32 %v2262_v24, %v812_v22  ;;  %v934_v62 = vmul.f32 %v2264_v46, %v813_v43 }
 0x1c3   :  { %1140 = vst [vmem:[#allocation8 + $0x2a0] sm:$0xff] %v1040_v4  ;;  %1141 = vst [vmem:[#allocation8 + $0x2a8] sm:$0xff] %v1041_v26  ;;  %v806_v59 = vmul.f32 %v2513_v30, %v2982_v17  ;;  %v807_v35 = vmul.f32 %v2513_v30, %v2983_v57  ;;  %v808_v54 = vmul.f32 %v2513_v30, %v2984_v5 }
 0x1c4   :  { %1142 = vst [vmem:[#allocation8 + $0x2b0] sm:$0xff] %v1042_v7  ;;  %1143 = vst [vmem:[#allocation8 + $0x2b8] sm:$0xff] %v1043_v23  ;;  %v809_v51 = vmul.f32 %v2513_v30, %v2985_v58  ;;  %v1052_v45 = vadd.f32 %v2266_v40, %v931_v42  ;;  %v1053_v18 = vadd.f32 %v2268_v41, %v932_v38 }
 0x1c5   :  { %v1054_v13 = vadd.f32 %v2270_v33, %v933_v52  ;;  %v1055_v1 = vadd.f32 %v2272_v36, %v934_v62  ;;  %v927_v34 = vmul.f32 %v2258_v29, %v806_v59  ;;  %v928_v16 = vmul.f32 %v2260_v28, %v807_v35 }
 0x1c6   :  { %v929_v8 = vmul.f32 %v2262_v24, %v808_v54  ;;  %v930_v11 = vmul.f32 %v2264_v46, %v809_v51  ;;  %1152 = vst [vmem:[#allocation8 + $0x300] sm:$0xf] %v1052_v45  ;;  %1153 = vst [vmem:[#allocation8 + $0x308] sm:$0xf] %v1053_v18 }
 0x1c7   :  { %1154 = vst [vmem:[#allocation8 + $0x310] sm:$0xf] %v1054_v13  ;;  %1155 = vst [vmem:[#allocation8 + $0x318] sm:$0xf] %v1055_v1  ;;  %v1048_v30 = vadd.f32 %v2266_v40, %v927_v34  ;;  %v1049_v61 = vadd.f32 %v2268_v41, %v928_v16 }
 0x1c8   :  { %v1050_v9 = vadd.f32 %v2270_v33, %v929_v8  ;;  %v1051_v44 = vadd.f32 %v2272_v36, %v930_v11 }
 0x1c9   :  { %1148 = vst [vmem:[#allocation8 + $0x2e0] sm:$0xff] %v1048_v30  ;;  %1149 = vst [vmem:[#allocation8 + $0x2e8] sm:$0xff] %v1049_v61 }
 0x1ca   :  { %1150 = vst [vmem:[#allocation8 + $0x2f0] sm:$0xff] %v1050_v9  ;;  %1151 = vst [vmem:[#allocation8 + $0x2f8] sm:$0xff] %v1051_v44 }
 0x1cb   :  { %1301 = shalt.err (!%p1298_p5)
}
 0x1cc   :  { %1167 = dma.vmem_to_hbm [thread:$0]  %s1162_s2, 12800, %s2640_s3, [#allocation4], %s1318_s20, %s1318_s20, %s1319_s21  }
 0x1cd   :  { %1314 = dma.done.wait [#allocation4], 12800  }
 0x1ce   :  { %1315 = vsyncadd [#allocation4], 4294954496 }
 0x1cf   :  { %1171 = vsyncpa [#allocation3], 1 }
 0x1d0   :  { %1172 = vsyncpa [#allocation6], 1 }
 0x1d1   :  { %1173 = vsyncpa [#allocation4], 1 }

</bundles_post_ra>
